<compile_context>
chip_gen: v6e
topology: v6e:2x2x1
jax: 0.10.0
libtpu: 0.0.40
codegen_flags: <defaults>
</compile_context>

<pallas_src>
import jax
import jax.numpy as jnp
from jax import lax
from jax.experimental import pallas as pl
from jax.experimental.pallas import tpu as pltpu

DT = 0.1       # self.dt in the PyTorch module
A_SIZE = 2     # self.action_size

_ROW_ALIGN = 16  # sublane alignment of packed sections (covers bf16 packing)


def _round_up(n, m):
    return ((n + m - 1) // m) * m


def _pack_rows(sections, lane_dim, dtype):
    """Stack 2-D arrays along the sublane axis into one lane-dense slab.

    Each section is zero-padded to `lane_dim` lanes and to a multiple of
    _ROW_ALIGN rows so every in-kernel slice start is sublane-aligned.
    Returns (slab, per-section row offsets).
    """
    blocks, offsets, r = [], [], 0
    for a in sections:
        rows, cols = a.shape
        pad_r = _round_up(rows, _ROW_ALIGN) - rows
        blocks.append(jnp.pad(a.astype(jnp.float32),
                              ((0, pad_r), (0, lane_dim - cols))))
        offsets.append(r)
        r += rows + pad_r
    return jnp.concatenate(blocks, axis=0).astype(dtype), offsets


def actor_forward(init_state, p, n_steps, *, matmul_dtype=jnp.bfloat16,
                  batch_chunks=1, full_unroll_max=16, loop_unroll=8):
    """Pallas rollout equivalent to Actor.forward (returns (n_steps, batch, 2))."""
    batch, S = init_state.shape
    H = p["w1"].shape[1]
    A2 = 2 * A_SIZE
    assert S == A_SIZE, "PD-control math requires state_size == action_size (2)"
    assert H >= A2, "hidden_size must be >= 4"
    assert batch % batch_chunks == 0
    bc = batch // batch_chunks
    if batch_chunks > 1:
        assert bc % 8 == 0, "per-chunk batch must be a multiple of 8 sublanes"

    # ---- parameter fusion + packing (once, outside the kernel) -------------
    bcat = p["bih"] + p["bhh"]                                   # (1, H)
    whead = jnp.concatenate([p["wrw"], p["wkp"]], axis=1)        # (H, 2*A)
    bhead = jnp.concatenate([p["brw"], p["bkp"]], axis=1)        # (1, 2*A)

    wslab, (ow1, owih, owhh, owo, owhd) = _pack_rows(
        [p["w1"], p["wih"], p["whh"], p["wo"], whead], H, matmul_dtype)
    fslab, (ob1, obct, obo, obhd) = _pack_rows(
        [p["b1"], bcat, p["bo"], bhead], H, jnp.float32)

    def kernel(init_ref, wslab_ref, fslab_ref, actions_ref):
        cdt = wslab_ref.dtype           # matmul operand dtype (bf16 by default)
        f32 = jnp.float32

        # --- one-time loads + broadcasts, hoisted above the rollout loop ----
        w1 = wslab_ref[ow1:ow1 + S, :]                      # (S, H)
        wih = wslab_ref[owih:owih + S, :]                   # (S, H)  RNNCell W_ih^T
        whh = wslab_ref[owhh:owhh + H, :]                   # (H, H)  RNNCell W_hh^T
        wo = wslab_ref[owo:owo + H, :]                      # (H, H)  output.W^T
        whd = wslab_ref[owhd:owhd + H, 0:A2]                # (H, 2A) fused heads W^T

        b1_b = jnp.broadcast_to(fslab_ref[ob1:ob1 + 1, :], (bc, H))
        bcat_b = jnp.broadcast_to(fslab_ref[obct:obct + 1, :], (bc, H))
        bo_b = jnp.broadcast_to(fslab_ref[obo:obo + 1, :], (bc, H))
        bhd_b = jnp.broadcast_to(fslab_ref[obhd:obhd + 1, 0:A2], (bc, A2))

        x = init_ref[...]                                   # (bc, S) f32

        # init_hidden = relu(state2hidden1(init_state))
        hidden = jnp.maximum(
            jnp.dot(x.astype(cdt), w1, preferred_element_type=f32) + b1_b, 0.0)
        w = x
        wd = jnp.zeros_like(x)
        ref_w = x

        def step(hidden, w, wd, ref_w):
            # nn.RNNCell(tanh): h' = tanh(ref_w Wih + h Whh + (bih + bhh))
            pre = (bcat_b
                   + jnp.dot(hidden.astype(cdt), whh, preferred_element_type=f32)
                   + jnp.dot(ref_w.astype(cdt), wih, preferred_element_type=f32))
            hidden = jnp.tanh(pre)
            # output head: relu(Linear(hidden))
            out = jnp.maximum(
                jnp.dot(hidden.astype(cdt), wo, preferred_element_type=f32)
                + bo_b, 0.0)
            # fused [output2refwd | output2kp]: one dot, split columns
            head = (jnp.dot(out.astype(cdt), whd, preferred_element_type=f32)
                    + bhd_b)
            ref_wd = jnp.tanh(head[:, :A_SIZE]) * 2.0
            kp = jax.nn.sigmoid(head[:, A_SIZE:]) * 30.0
            ref_w = ref_w + ref_wd * DT
            kd = 2.0 * jnp.sqrt(kp)
            action = kp * (ref_w - w) + kd * (ref_wd - wd)
            # TODO(synk): Masspoint_one_step(1, 1) source was not provided; assume
            # a unit-mass, zero-external-force semi-implicit Euler integrator:
            # wdd = action; wd += wdd*dt; w += wd*dt.
            wd = wd + action * DT
            w = w + wd * DT
            return hidden, w, wd, ref_w, action

        if n_steps <= full_unroll_max:
            # Short rollout: full trace-time unroll, stack actions, ONE bulk store.
            acts = []
            for _ in range(n_steps):
                hidden, w, wd, ref_w, action = step(hidden, w, wd, ref_w)
                acts.append(action)
            actions_ref[...] = jnp.stack(acts, axis=0)
        else:
            # Long rollout: partial unroll keeps LLO visibility without code-size
            # blowup; per-step ref stores (dynamic leading-dim index).
            def body(n, carry):
                hidden, w, wd, ref_w = carry
                hidden, w, wd, ref_w, action = step(hidden, w, wd, ref_w)
                actions_ref[n] = action
                return hidden, w, wd, ref_w
            lax.fori_loop(0, n_steps, body, (hidden, w, wd, ref_w),
                          unroll=min(int(loop_unroll), n_steps))

    grid_spec = pltpu.PrefetchScalarGridSpec(
        num_scalar_prefetch=0,
        # Grid over independent batch chunks only; the time loop is in-kernel.
        grid=(batch_chunks,),
        in_specs=[
            pl.BlockSpec((bc, S), lambda i: (i, 0)),        # init_state chunk
            pl.BlockSpec(wslab.shape, lambda i: (0, 0)),    # bf16 weight slab
            pl.BlockSpec(fslab.shape, lambda i: (0, 0)),    # f32 bias slab
        ],
        out_specs=pl.BlockSpec((n_steps, bc, A_SIZE), lambda i: (0, i, 0)),
        scratch_shapes=[],
    )

    return pl.pallas_call(
        kernel,
        out_shape=jax.ShapeDtypeStruct((n_steps, batch, A_SIZE), jnp.float32),
        grid_spec=grid_spec,
        # Batch chunks are independent -> "parallel" (shards across the two
        # TensorCores on v7x; harmless sequential loop on v5e/v6e).
        compiler_params=pltpu.CompilerParams(
            dimension_semantics=("parallel",)),
    )(init_state, wslab, fslab)


def actor_reference(init_state, p, n_steps, *, matmul_dtype=jnp.float32):
    """Pure-JAX reference of the same forward pass.

    With matmul_dtype=jnp.float32 this is the straight f32 module math; with
    matmul_dtype=jnp.bfloat16 it mirrors the kernel's precision choice exactly
    (bf16 matmul operands, f32 accumulation, f32 element-wise math).
    """
    f32 = jnp.float32

    def dot(a, b):
        return jnp.dot(a.astype(matmul_dtype), b.astype(matmul_dtype),
                       preferred_element_type=f32)

    bcat = p["bih"] + p["bhh"]
    hidden = jax.nn.relu(dot(init_state, p["w1"]) + p["b1"][0])
    w = init_state
    wd = jnp.zeros_like(w)
    ref_w = w
    acts = []
    for _ in range(n_steps):
        hidden = jnp.tanh(dot(ref_w, p["wih"]) + dot(hidden, p["whh"]) + bcat[0])
        out = jax.nn.relu(dot(hidden, p["wo"]) + p["bo"][0])
        ref_wd = jnp.tanh(dot(out, p["wrw"]) + p["brw"][0]) * 2.0
        kp = jax.nn.sigmoid(dot(out, p["wkp"]) + p["bkp"][0]) * 30.0
        ref_w = ref_w + ref_wd * DT
        kd = 2.0 * jnp.sqrt(kp)
        action = kp * (ref_w - w) + kd * (ref_wd - wd)
        wd = wd + action * DT
        w = w + wd * DT
        acts.append(action)
    return jnp.stack(acts)


def init_params(key, state_size, hidden_size, a_size=A_SIZE):
    ks = jax.random.split(key, 12)

    def w(k, shape, fan_in):
        return (jax.random.normal(k, shape, jnp.float32)
                / jnp.sqrt(fan_in)).astype(jnp.float32)

    return {
        "w1":  w(ks[0], (state_size, hidden_size), state_size),
        "b1":  w(ks[1], (1, hidden_size), hidden_size),
        "wih": w(ks[2], (state_size, hidden_size), state_size),
        "bih": w(ks[3], (1, hidden_size), hidden_size),
        "whh": w(ks[4], (hidden_size, hidden_size), hidden_size),
        "bhh": w(ks[5], (1, hidden_size), hidden_size),
        "wo":  w(ks[6], (hidden_size, hidden_size), hidden_size),
        "bo":  w(ks[7], (1, hidden_size), hidden_size),
        "wrw": w(ks[8], (hidden_size, a_size), hidden_size),
        "brw": w(ks[9], (1, a_size), hidden_size),
        "wkp": w(ks[10], (hidden_size, a_size), hidden_size),
        "bkp": w(ks[11], (1, a_size), hidden_size),
    }


if __name__ == "__main__":
    state_size = 2      # must equal action_size=2 for the module's PD math
    hidden_size = 32
    batch = 16          # multiple of 8 sublanes (per perf review)

    key = jax.random.PRNGKey(0)
    k_param, k_state = jax.random.split(key)
    params = init_params(k_param, state_size, hidden_size)
    init_state = jax.random.normal(k_state, (batch, state_size), jnp.float32)

    # Config A: short rollout -> fully unrolled static path, single bulk store,
    # batch split into 2 "parallel" chunks (engages both v7x TensorCores).
    n_steps_a = 8
    acts_a = jax.block_until_ready(
        actor_forward(init_state, params, n_steps_a, batch_chunks=2))
    ref_a = actor_reference(init_state, params, n_steps_a,
                            matmul_dtype=jnp.bfloat16)
    assert acts_a.shape == (n_steps_a, batch, A_SIZE)
    assert jnp.allclose(acts_a, ref_a, atol=1e-2, rtol=1e-2), (
        f"config A max abs diff {jnp.max(jnp.abs(acts_a - ref_a))}")

    # Config B: longer rollout -> partially unrolled fori_loop path.
    n_steps_b = 24
    acts_b = jax.block_until_ready(
        actor_forward(init_state, params, n_steps_b, batch_chunks=1))
    ref_b = actor_reference(init_state, params, n_steps_b,
                            matmul_dtype=jnp.bfloat16)
    assert acts_b.shape == (n_steps_b, batch, A_SIZE)
    assert jnp.allclose(acts_b, ref_b, atol=1e-2, rtol=1e-2), (
        f"config B max abs diff {jnp.max(jnp.abs(acts_b - ref_b))}")

    print("KERNEL_OK")
</pallas_src>

<mosaic_0001>
module attributes {stable_mosaic.version = 11 : i64} {
  func.func @kernel(%arg0: i32, %arg1: memref<8x2xf32, #tpu.memory_space<vmem>>, %arg2: memref<128x32xbf16, #tpu.memory_space<vmem>>, %arg3: memref<64x32xf32, #tpu.memory_space<vmem>>, %arg4: memref<8x8x2xf32, #tpu.memory_space<vmem>>) attributes {dimension_semantics = [#tpu.dimension_semantics<parallel>], iteration_bounds = array<i64: 2>, scalar_prefetch = 0 : i64, scratch_operands = 0 : i64, tpu.core_type = #tpu.core_type<tc>, window_params = [{transform_indices = @transform_0, window_bounds = array<i64: 8, 2>}, {pipeline_mode = #tpu.pipeline_mode<synchronous>, transform_indices = @transform_1, window_bounds = array<i64: 128, 32>}, {pipeline_mode = #tpu.pipeline_mode<synchronous>, transform_indices = @transform_2, window_bounds = array<i64: 64, 32>}, {transform_indices = @transform_3, window_bounds = array<i64: 8, 8, 2>}]} {
    %c0 = arith.constant 0 : index
    %c0_0 = arith.constant 0 : index
    %0 = vector.load %arg2[%c0, %c0_0] : memref<128x32xbf16, #tpu.memory_space<vmem>>, vector<2x32xbf16>
    %c16 = arith.constant 16 : index
    %c0_1 = arith.constant 0 : index
    %1 = vector.load %arg2[%c16, %c0_1] : memref<128x32xbf16, #tpu.memory_space<vmem>>, vector<2x32xbf16>
    %c32 = arith.constant 32 : index
    %c0_2 = arith.constant 0 : index
    %2 = vector.load %arg2[%c32, %c0_2] : memref<128x32xbf16, #tpu.memory_space<vmem>>, vector<32x32xbf16>
    %c64 = arith.constant 64 : index
    %c0_3 = arith.constant 0 : index
    %3 = vector.load %arg2[%c64, %c0_3] : memref<128x32xbf16, #tpu.memory_space<vmem>>, vector<32x32xbf16>
    %c96 = arith.constant 96 : index
    %c0_4 = arith.constant 0 : index
    %4 = vector.load %arg2[%c96, %c0_4] : memref<128x32xbf16, #tpu.memory_space<vmem>>, vector<32x4xbf16>
    %c0_5 = arith.constant 0 : index
    %c0_6 = arith.constant 0 : index
    %5 = vector.load %arg3[%c0_5, %c0_6] : memref<64x32xf32, #tpu.memory_space<vmem>>, vector<1x32xf32>
    %6 = vector.shape_cast %5 : vector<1x32xf32> to vector<1x32xf32>
    %7 = vector.broadcast %6 : vector<1x32xf32> to vector<8x32xf32>
    %c16_7 = arith.constant 16 : index
    %c0_8 = arith.constant 0 : index
    %8 = vector.load %arg3[%c16_7, %c0_8] : memref<64x32xf32, #tpu.memory_space<vmem>>, vector<1x32xf32>
    %9 = vector.shape_cast %8 : vector<1x32xf32> to vector<1x32xf32>
    %10 = vector.broadcast %9 : vector<1x32xf32> to vector<8x32xf32>
    %c32_9 = arith.constant 32 : index
    %c0_10 = arith.constant 0 : index
    %11 = vector.load %arg3[%c32_9, %c0_10] : memref<64x32xf32, #tpu.memory_space<vmem>>, vector<1x32xf32>
    %12 = vector.shape_cast %11 : vector<1x32xf32> to vector<1x32xf32>
    %13 = vector.broadcast %12 : vector<1x32xf32> to vector<8x32xf32>
    %c48 = arith.constant 48 : index
    %c0_11 = arith.constant 0 : index
    %14 = vector.load %arg3[%c48, %c0_11] : memref<64x32xf32, #tpu.memory_space<vmem>>, vector<1x4xf32>
    %15 = vector.shape_cast %14 : vector<1x4xf32> to vector<1x4xf32>
    %16 = vector.broadcast %15 : vector<1x4xf32> to vector<8x4xf32>
    %c0_12 = arith.constant 0 : index
    %c0_13 = arith.constant 0 : index
    %17 = vector.load %arg1[%c0_12, %c0_13] : memref<8x2xf32, #tpu.memory_space<vmem>>, vector<8x2xf32>
    %18 = arith.truncf %17 : vector<8x2xf32> to vector<8x2xbf16>
    %cst = arith.constant dense<0.000000e+00> : vector<8x32xf32>
    %19 = tpu.matmul %18, %0, %cst {dimension_numbers = #tpu.dot_dimension_numbers<[1], [0], [0], [1], [0, 0, 1, 1], [], []>} : vector<8x2xbf16>, vector<2x32xbf16>, vector<8x32xf32> -> vector<8x32xf32>
    %20 = arith.addf %19, %7 : vector<8x32xf32>
    %cst_14 = arith.constant 0.000000e+00 : f32
    %21 = vector.broadcast %cst_14 : f32 to vector<8x32xf32>
    %22 = arith.maximumf %20, %21 : vector<8x32xf32>
    %cst_15 = arith.constant 0.000000e+00 : f32
    %23 = vector.broadcast %cst_15 : f32 to vector<8x2xf32>
    %24 = arith.truncf %22 : vector<8x32xf32> to vector<8x32xbf16>
    %cst_16 = arith.constant dense<0.000000e+00> : vector<8x32xf32>
    %25 = tpu.matmul %24, %2, %cst_16 {dimension_numbers = #tpu.dot_dimension_numbers<[1], [0], [0], [1], [0, 0, 1, 1], [], []>} : vector<8x32xbf16>, vector<32x32xbf16>, vector<8x32xf32> -> vector<8x32xf32>
    %26 = arith.addf %10, %25 : vector<8x32xf32>
    %27 = arith.truncf %17 : vector<8x2xf32> to vector<8x2xbf16>
    %cst_17 = arith.constant dense<0.000000e+00> : vector<8x32xf32>
    %28 = tpu.matmul %27, %1, %cst_17 {dimension_numbers = #tpu.dot_dimension_numbers<[1], [0], [0], [1], [0, 0, 1, 1], [], []>} : vector<8x2xbf16>, vector<2x32xbf16>, vector<8x32xf32> -> vector<8x32xf32>
    %29 = arith.addf %26, %28 : vector<8x32xf32>
    %30 = math.tanh %29 : vector<8x32xf32>
    %31 = arith.truncf %30 : vector<8x32xf32> to vector<8x32xbf16>
    %cst_18 = arith.constant dense<0.000000e+00> : vector<8x32xf32>
    %32 = tpu.matmul %31, %3, %cst_18 {dimension_numbers = #tpu.dot_dimension_numbers<[1], [0], [0], [1], [0, 0, 1, 1], [], []>} : vector<8x32xbf16>, vector<32x32xbf16>, vector<8x32xf32> -> vector<8x32xf32>
    %33 = arith.addf %32, %13 : vector<8x32xf32>
    %cst_19 = arith.constant 0.000000e+00 : f32
    %34 = vector.broadcast %cst_19 : f32 to vector<8x32xf32>
    %35 = arith.maximumf %33, %34 : vector<8x32xf32>
    %36 = arith.truncf %35 : vector<8x32xf32> to vector<8x32xbf16>
    %cst_20 = arith.constant dense<0.000000e+00> : vector<8x4xf32>
    %37 = tpu.matmul %36, %4, %cst_20 {dimension_numbers = #tpu.dot_dimension_numbers<[1], [0], [0], [1], [0, 0, 1, 1], [], []>} : vector<8x32xbf16>, vector<32x4xbf16>, vector<8x4xf32> -> vector<8x4xf32>
    %38 = arith.addf %37, %16 : vector<8x4xf32>
    %39 = vector.extract_strided_slice %38 {offsets = [0, 0], sizes = [8, 2], strides = [1, 1]} : vector<8x4xf32> to vector<8x2xf32>
    %40 = math.tanh %39 : vector<8x2xf32>
    %cst_21 = arith.constant 2.000000e+00 : f32
    %41 = vector.broadcast %cst_21 : f32 to vector<8x2xf32>
    %42 = arith.mulf %40, %41 : vector<8x2xf32>
    %43 = vector.extract_strided_slice %38 {offsets = [0, 2], sizes = [8, 2], strides = [1, 1]} : vector<8x4xf32> to vector<8x2xf32>
    %44 = arith.negf %43 : vector<8x2xf32>
    %45 = math.exp %44 : vector<8x2xf32>
    %cst_22 = arith.constant 1.000000e+00 : f32
    %46 = vector.broadcast %cst_22 : f32 to vector<8x2xf32>
    %47 = arith.addf %46, %45 : vector<8x2xf32>
    %48 = arith.divf %46, %47 : vector<8x2xf32>
    %cst_23 = arith.constant 3.000000e+01 : f32
    %49 = vector.broadcast %cst_23 : f32 to vector<8x2xf32>
    %50 = arith.mulf %48, %49 : vector<8x2xf32>
    %cst_24 = arith.constant 1.000000e-01 : f32
    %51 = vector.broadcast %cst_24 : f32 to vector<8x2xf32>
    %52 = arith.mulf %42, %51 : vector<8x2xf32>
    %53 = arith.addf %17, %52 : vector<8x2xf32>
    %54 = math.sqrt %50 : vector<8x2xf32>
    %cst_25 = arith.constant 2.000000e+00 : f32
    %55 = vector.broadcast %cst_25 : f32 to vector<8x2xf32>
    %56 = arith.mulf %55, %54 : vector<8x2xf32>
    %57 = arith.subf %53, %17 : vector<8x2xf32>
    %58 = arith.mulf %50, %57 : vector<8x2xf32>
    %59 = arith.subf %42, %23 : vector<8x2xf32>
    %60 = arith.mulf %56, %59 : vector<8x2xf32>
    %61 = arith.addf %58, %60 : vector<8x2xf32>
    %cst_26 = arith.constant 1.000000e-01 : f32
    %62 = vector.broadcast %cst_26 : f32 to vector<8x2xf32>
    %63 = arith.mulf %61, %62 : vector<8x2xf32>
    %64 = arith.addf %23, %63 : vector<8x2xf32>
    %cst_27 = arith.constant 1.000000e-01 : f32
    %65 = vector.broadcast %cst_27 : f32 to vector<8x2xf32>
    %66 = arith.mulf %64, %65 : vector<8x2xf32>
    %67 = arith.addf %17, %66 : vector<8x2xf32>
    %68 = arith.truncf %30 : vector<8x32xf32> to vector<8x32xbf16>
    %cst_28 = arith.constant dense<0.000000e+00> : vector<8x32xf32>
    %69 = tpu.matmul %68, %2, %cst_28 {dimension_numbers = #tpu.dot_dimension_numbers<[1], [0], [0], [1], [0, 0, 1, 1], [], []>} : vector<8x32xbf16>, vector<32x32xbf16>, vector<8x32xf32> -> vector<8x32xf32>
    %70 = arith.addf %10, %69 : vector<8x32xf32>
    %71 = arith.truncf %53 : vector<8x2xf32> to vector<8x2xbf16>
    %cst_29 = arith.constant dense<0.000000e+00> : vector<8x32xf32>
    %72 = tpu.matmul %71, %1, %cst_29 {dimension_numbers = #tpu.dot_dimension_numbers<[1], [0], [0], [1], [0, 0, 1, 1], [], []>} : vector<8x2xbf16>, vector<2x32xbf16>, vector<8x32xf32> -> vector<8x32xf32>
    %73 = arith.addf %70, %72 : vector<8x32xf32>
    %74 = math.tanh %73 : vector<8x32xf32>
    %75 = arith.truncf %74 : vector<8x32xf32> to vector<8x32xbf16>
    %cst_30 = arith.constant dense<0.000000e+00> : vector<8x32xf32>
    %76 = tpu.matmul %75, %3, %cst_30 {dimension_numbers = #tpu.dot_dimension_numbers<[1], [0], [0], [1], [0, 0, 1, 1], [], []>} : vector<8x32xbf16>, vector<32x32xbf16>, vector<8x32xf32> -> vector<8x32xf32>
    %77 = arith.addf %76, %13 : vector<8x32xf32>
    %cst_31 = arith.constant 0.000000e+00 : f32
    %78 = vector.broadcast %cst_31 : f32 to vector<8x32xf32>
    %79 = arith.maximumf %77, %78 : vector<8x32xf32>
    %80 = arith.truncf %79 : vector<8x32xf32> to vector<8x32xbf16>
    %cst_32 = arith.constant dense<0.000000e+00> : vector<8x4xf32>
    %81 = tpu.matmul %80, %4, %cst_32 {dimension_numbers = #tpu.dot_dimension_numbers<[1], [0], [0], [1], [0, 0, 1, 1], [], []>} : vector<8x32xbf16>, vector<32x4xbf16>, vector<8x4xf32> -> vector<8x4xf32>
    %82 = arith.addf %81, %16 : vector<8x4xf32>
    %83 = vector.extract_strided_slice %82 {offsets = [0, 0], sizes = [8, 2], strides = [1, 1]} : vector<8x4xf32> to vector<8x2xf32>
    %84 = math.tanh %83 : vector<8x2xf32>
    %cst_33 = arith.constant 2.000000e+00 : f32
    %85 = vector.broadcast %cst_33 : f32 to vector<8x2xf32>
    %86 = arith.mulf %84, %85 : vector<8x2xf32>
    %87 = vector.extract_strided_slice %82 {offsets = [0, 2], sizes = [8, 2], strides = [1, 1]} : vector<8x4xf32> to vector<8x2xf32>
    %88 = arith.negf %87 : vector<8x2xf32>
    %89 = math.exp %88 : vector<8x2xf32>
    %cst_34 = arith.constant 1.000000e+00 : f32
    %90 = vector.broadcast %cst_34 : f32 to vector<8x2xf32>
    %91 = arith.addf %90, %89 : vector<8x2xf32>
    %92 = arith.divf %90, %91 : vector<8x2xf32>
    %cst_35 = arith.constant 3.000000e+01 : f32
    %93 = vector.broadcast %cst_35 : f32 to vector<8x2xf32>
    %94 = arith.mulf %92, %93 : vector<8x2xf32>
    %cst_36 = arith.constant 1.000000e-01 : f32
    %95 = vector.broadcast %cst_36 : f32 to vector<8x2xf32>
    %96 = arith.mulf %86, %95 : vector<8x2xf32>
    %97 = arith.addf %53, %96 : vector<8x2xf32>
    %98 = math.sqrt %94 : vector<8x2xf32>
    %cst_37 = arith.constant 2.000000e+00 : f32
    %99 = vector.broadcast %cst_37 : f32 to vector<8x2xf32>
    %100 = arith.mulf %99, %98 : vector<8x2xf32>
    %101 = arith.subf %97, %67 : vector<8x2xf32>
    %102 = arith.mulf %94, %101 : vector<8x2xf32>
    %103 = arith.subf %86, %64 : vector<8x2xf32>
    %104 = arith.mulf %100, %103 : vector<8x2xf32>
    %105 = arith.addf %102, %104 : vector<8x2xf32>
    %cst_38 = arith.constant 1.000000e-01 : f32
    %106 = vector.broadcast %cst_38 : f32 to vector<8x2xf32>
    %107 = arith.mulf %105, %106 : vector<8x2xf32>
    %108 = arith.addf %64, %107 : vector<8x2xf32>
    %cst_39 = arith.constant 1.000000e-01 : f32
    %109 = vector.broadcast %cst_39 : f32 to vector<8x2xf32>
    %110 = arith.mulf %108, %109 : vector<8x2xf32>
    %111 = arith.addf %67, %110 : vector<8x2xf32>
    %112 = arith.truncf %74 : vector<8x32xf32> to vector<8x32xbf16>
    %cst_40 = arith.constant dense<0.000000e+00> : vector<8x32xf32>
    %113 = tpu.matmul %112, %2, %cst_40 {dimension_numbers = #tpu.dot_dimension_numbers<[1], [0], [0], [1], [0, 0, 1, 1], [], []>} : vector<8x32xbf16>, vector<32x32xbf16>, vector<8x32xf32> -> vector<8x32xf32>
    %114 = arith.addf %10, %113 : vector<8x32xf32>
    %115 = arith.truncf %97 : vector<8x2xf32> to vector<8x2xbf16>
    %cst_41 = arith.constant dense<0.000000e+00> : vector<8x32xf32>
    %116 = tpu.matmul %115, %1, %cst_41 {dimension_numbers = #tpu.dot_dimension_numbers<[1], [0], [0], [1], [0, 0, 1, 1], [], []>} : vector<8x2xbf16>, vector<2x32xbf16>, vector<8x32xf32> -> vector<8x32xf32>
    %117 = arith.addf %114, %116 : vector<8x32xf32>
    %118 = math.tanh %117 : vector<8x32xf32>
    %119 = arith.truncf %118 : vector<8x32xf32> to vector<8x32xbf16>
    %cst_42 = arith.constant dense<0.000000e+00> : vector<8x32xf32>
    %120 = tpu.matmul %119, %3, %cst_42 {dimension_numbers = #tpu.dot_dimension_numbers<[1], [0], [0], [1], [0, 0, 1, 1], [], []>} : vector<8x32xbf16>, vector<32x32xbf16>, vector<8x32xf32> -> vector<8x32xf32>
    %121 = arith.addf %120, %13 : vector<8x32xf32>
    %cst_43 = arith.constant 0.000000e+00 : f32
    %122 = vector.broadcast %cst_43 : f32 to vector<8x32xf32>
    %123 = arith.maximumf %121, %122 : vector<8x32xf32>
    %124 = arith.truncf %123 : vector<8x32xf32> to vector<8x32xbf16>
    %cst_44 = arith.constant dense<0.000000e+00> : vector<8x4xf32>
    %125 = tpu.matmul %124, %4, %cst_44 {dimension_numbers = #tpu.dot_dimension_numbers<[1], [0], [0], [1], [0, 0, 1, 1], [], []>} : vector<8x32xbf16>, vector<32x4xbf16>, vector<8x4xf32> -> vector<8x4xf32>
    %126 = arith.addf %125, %16 : vector<8x4xf32>
    %127 = vector.extract_strided_slice %126 {offsets = [0, 0], sizes = [8, 2], strides = [1, 1]} : vector<8x4xf32> to vector<8x2xf32>
    %128 = math.tanh %127 : vector<8x2xf32>
    %cst_45 = arith.constant 2.000000e+00 : f32
    %129 = vector.broadcast %cst_45 : f32 to vector<8x2xf32>
    %130 = arith.mulf %128, %129 : vector<8x2xf32>
    %131 = vector.extract_strided_slice %126 {offsets = [0, 2], sizes = [8, 2], strides = [1, 1]} : vector<8x4xf32> to vector<8x2xf32>
    %132 = arith.negf %131 : vector<8x2xf32>
    %133 = math.exp %132 : vector<8x2xf32>
    %cst_46 = arith.constant 1.000000e+00 : f32
    %134 = vector.broadcast %cst_46 : f32 to vector<8x2xf32>
    %135 = arith.addf %134, %133 : vector<8x2xf32>
    %136 = arith.divf %134, %135 : vector<8x2xf32>
    %cst_47 = arith.constant 3.000000e+01 : f32
    %137 = vector.broadcast %cst_47 : f32 to vector<8x2xf32>
    %138 = arith.mulf %136, %137 : vector<8x2xf32>
    %cst_48 = arith.constant 1.000000e-01 : f32
    %139 = vector.broadcast %cst_48 : f32 to vector<8x2xf32>
    %140 = arith.mulf %130, %139 : vector<8x2xf32>
    %141 = arith.addf %97, %140 : vector<8x2xf32>
    %142 = math.sqrt %138 : vector<8x2xf32>
    %cst_49 = arith.constant 2.000000e+00 : f32
    %143 = vector.broadcast %cst_49 : f32 to vector<8x2xf32>
    %144 = arith.mulf %143, %142 : vector<8x2xf32>
    %145 = arith.subf %141, %111 : vector<8x2xf32>
    %146 = arith.mulf %138, %145 : vector<8x2xf32>
    %147 = arith.subf %130, %108 : vector<8x2xf32>
    %148 = arith.mulf %144, %147 : vector<8x2xf32>
    %149 = arith.addf %146, %148 : vector<8x2xf32>
    %cst_50 = arith.constant 1.000000e-01 : f32
    %150 = vector.broadcast %cst_50 : f32 to vector<8x2xf32>
    %151 = arith.mulf %149, %150 : vector<8x2xf32>
    %152 = arith.addf %108, %151 : vector<8x2xf32>
    %cst_51 = arith.constant 1.000000e-01 : f32
    %153 = vector.broadcast %cst_51 : f32 to vector<8x2xf32>
    %154 = arith.mulf %152, %153 : vector<8x2xf32>
    %155 = arith.addf %111, %154 : vector<8x2xf32>
    %156 = arith.truncf %118 : vector<8x32xf32> to vector<8x32xbf16>
    %cst_52 = arith.constant dense<0.000000e+00> : vector<8x32xf32>
    %157 = tpu.matmul %156, %2, %cst_52 {dimension_numbers = #tpu.dot_dimension_numbers<[1], [0], [0], [1], [0, 0, 1, 1], [], []>} : vector<8x32xbf16>, vector<32x32xbf16>, vector<8x32xf32> -> vector<8x32xf32>
    %158 = arith.addf %10, %157 : vector<8x32xf32>
    %159 = arith.truncf %141 : vector<8x2xf32> to vector<8x2xbf16>
    %cst_53 = arith.constant dense<0.000000e+00> : vector<8x32xf32>
    %160 = tpu.matmul %159, %1, %cst_53 {dimension_numbers = #tpu.dot_dimension_numbers<[1], [0], [0], [1], [0, 0, 1, 1], [], []>} : vector<8x2xbf16>, vector<2x32xbf16>, vector<8x32xf32> -> vector<8x32xf32>
    %161 = arith.addf %158, %160 : vector<8x32xf32>
    %162 = math.tanh %161 : vector<8x32xf32>
    %163 = arith.truncf %162 : vector<8x32xf32> to vector<8x32xbf16>
    %cst_54 = arith.constant dense<0.000000e+00> : vector<8x32xf32>
    %164 = tpu.matmul %163, %3, %cst_54 {dimension_numbers = #tpu.dot_dimension_numbers<[1], [0], [0], [1], [0, 0, 1, 1], [], []>} : vector<8x32xbf16>, vector<32x32xbf16>, vector<8x32xf32> -> vector<8x32xf32>
    %165 = arith.addf %164, %13 : vector<8x32xf32>
    %cst_55 = arith.constant 0.000000e+00 : f32
    %166 = vector.broadcast %cst_55 : f32 to vector<8x32xf32>
    %167 = arith.maximumf %165, %166 : vector<8x32xf32>
    %168 = arith.truncf %167 : vector<8x32xf32> to vector<8x32xbf16>
    %cst_56 = arith.constant dense<0.000000e+00> : vector<8x4xf32>
    %169 = tpu.matmul %168, %4, %cst_56 {dimension_numbers = #tpu.dot_dimension_numbers<[1], [0], [0], [1], [0, 0, 1, 1], [], []>} : vector<8x32xbf16>, vector<32x4xbf16>, vector<8x4xf32> -> vector<8x4xf32>
    %170 = arith.addf %169, %16 : vector<8x4xf32>
    %171 = vector.extract_strided_slice %170 {offsets = [0, 0], sizes = [8, 2], strides = [1, 1]} : vector<8x4xf32> to vector<8x2xf32>
    %172 = math.tanh %171 : vector<8x2xf32>
    %cst_57 = arith.constant 2.000000e+00 : f32
    %173 = vector.broadcast %cst_57 : f32 to vector<8x2xf32>
    %174 = arith.mulf %172, %173 : vector<8x2xf32>
    %175 = vector.extract_strided_slice %170 {offsets = [0, 2], sizes = [8, 2], strides = [1, 1]} : vector<8x4xf32> to vector<8x2xf32>
    %176 = arith.negf %175 : vector<8x2xf32>
    %177 = math.exp %176 : vector<8x2xf32>
    %cst_58 = arith.constant 1.000000e+00 : f32
    %178 = vector.broadcast %cst_58 : f32 to vector<8x2xf32>
    %179 = arith.addf %178, %177 : vector<8x2xf32>
    %180 = arith.divf %178, %179 : vector<8x2xf32>
    %cst_59 = arith.constant 3.000000e+01 : f32
    %181 = vector.broadcast %cst_59 : f32 to vector<8x2xf32>
    %182 = arith.mulf %180, %181 : vector<8x2xf32>
    %cst_60 = arith.constant 1.000000e-01 : f32
    %183 = vector.broadcast %cst_60 : f32 to vector<8x2xf32>
    %184 = arith.mulf %174, %183 : vector<8x2xf32>
    %185 = arith.addf %141, %184 : vector<8x2xf32>
    %186 = math.sqrt %182 : vector<8x2xf32>
    %cst_61 = arith.constant 2.000000e+00 : f32
    %187 = vector.broadcast %cst_61 : f32 to vector<8x2xf32>
    %188 = arith.mulf %187, %186 : vector<8x2xf32>
    %189 = arith.subf %185, %155 : vector<8x2xf32>
    %190 = arith.mulf %182, %189 : vector<8x2xf32>
    %191 = arith.subf %174, %152 : vector<8x2xf32>
    %192 = arith.mulf %188, %191 : vector<8x2xf32>
    %193 = arith.addf %190, %192 : vector<8x2xf32>
    %cst_62 = arith.constant 1.000000e-01 : f32
    %194 = vector.broadcast %cst_62 : f32 to vector<8x2xf32>
    %195 = arith.mulf %193, %194 : vector<8x2xf32>
    %196 = arith.addf %152, %195 : vector<8x2xf32>
    %cst_63 = arith.constant 1.000000e-01 : f32
    %197 = vector.broadcast %cst_63 : f32 to vector<8x2xf32>
    %198 = arith.mulf %196, %197 : vector<8x2xf32>
    %199 = arith.addf %155, %198 : vector<8x2xf32>
    %200 = arith.truncf %162 : vector<8x32xf32> to vector<8x32xbf16>
    %cst_64 = arith.constant dense<0.000000e+00> : vector<8x32xf32>
    %201 = tpu.matmul %200, %2, %cst_64 {dimension_numbers = #tpu.dot_dimension_numbers<[1], [0], [0], [1], [0, 0, 1, 1], [], []>} : vector<8x32xbf16>, vector<32x32xbf16>, vector<8x32xf32> -> vector<8x32xf32>
    %202 = arith.addf %10, %201 : vector<8x32xf32>
    %203 = arith.truncf %185 : vector<8x2xf32> to vector<8x2xbf16>
    %cst_65 = arith.constant dense<0.000000e+00> : vector<8x32xf32>
    %204 = tpu.matmul %203, %1, %cst_65 {dimension_numbers = #tpu.dot_dimension_numbers<[1], [0], [0], [1], [0, 0, 1, 1], [], []>} : vector<8x2xbf16>, vector<2x32xbf16>, vector<8x32xf32> -> vector<8x32xf32>
    %205 = arith.addf %202, %204 : vector<8x32xf32>
    %206 = math.tanh %205 : vector<8x32xf32>
    %207 = arith.truncf %206 : vector<8x32xf32> to vector<8x32xbf16>
    %cst_66 = arith.constant dense<0.000000e+00> : vector<8x32xf32>
    %208 = tpu.matmul %207, %3, %cst_66 {dimension_numbers = #tpu.dot_dimension_numbers<[1], [0], [0], [1], [0, 0, 1, 1], [], []>} : vector<8x32xbf16>, vector<32x32xbf16>, vector<8x32xf32> -> vector<8x32xf32>
    %209 = arith.addf %208, %13 : vector<8x32xf32>
    %cst_67 = arith.constant 0.000000e+00 : f32
    %210 = vector.broadcast %cst_67 : f32 to vector<8x32xf32>
    %211 = arith.maximumf %209, %210 : vector<8x32xf32>
    %212 = arith.truncf %211 : vector<8x32xf32> to vector<8x32xbf16>
    %cst_68 = arith.constant dense<0.000000e+00> : vector<8x4xf32>
    %213 = tpu.matmul %212, %4, %cst_68 {dimension_numbers = #tpu.dot_dimension_numbers<[1], [0], [0], [1], [0, 0, 1, 1], [], []>} : vector<8x32xbf16>, vector<32x4xbf16>, vector<8x4xf32> -> vector<8x4xf32>
    %214 = arith.addf %213, %16 : vector<8x4xf32>
    %215 = vector.extract_strided_slice %214 {offsets = [0, 0], sizes = [8, 2], strides = [1, 1]} : vector<8x4xf32> to vector<8x2xf32>
    %216 = math.tanh %215 : vector<8x2xf32>
    %cst_69 = arith.constant 2.000000e+00 : f32
    %217 = vector.broadcast %cst_69 : f32 to vector<8x2xf32>
    %218 = arith.mulf %216, %217 : vector<8x2xf32>
    %219 = vector.extract_strided_slice %214 {offsets = [0, 2], sizes = [8, 2], strides = [1, 1]} : vector<8x4xf32> to vector<8x2xf32>
    %220 = arith.negf %219 : vector<8x2xf32>
    %221 = math.exp %220 : vector<8x2xf32>
    %cst_70 = arith.constant 1.000000e+00 : f32
    %222 = vector.broadcast %cst_70 : f32 to vector<8x2xf32>
    %223 = arith.addf %222, %221 : vector<8x2xf32>
    %224 = arith.divf %222, %223 : vector<8x2xf32>
    %cst_71 = arith.constant 3.000000e+01 : f32
    %225 = vector.broadcast %cst_71 : f32 to vector<8x2xf32>
    %226 = arith.mulf %224, %225 : vector<8x2xf32>
    %cst_72 = arith.constant 1.000000e-01 : f32
    %227 = vector.broadcast %cst_72 : f32 to vector<8x2xf32>
    %228 = arith.mulf %218, %227 : vector<8x2xf32>
    %229 = arith.addf %185, %228 : vector<8x2xf32>
    %230 = math.sqrt %226 : vector<8x2xf32>
    %cst_73 = arith.constant 2.000000e+00 : f32
    %231 = vector.broadcast %cst_73 : f32 to vector<8x2xf32>
    %232 = arith.mulf %231, %230 : vector<8x2xf32>
    %233 = arith.subf %229, %199 : vector<8x2xf32>
    %234 = arith.mulf %226, %233 : vector<8x2xf32>
    %235 = arith.subf %218, %196 : vector<8x2xf32>
    %236 = arith.mulf %232, %235 : vector<8x2xf32>
    %237 = arith.addf %234, %236 : vector<8x2xf32>
    %cst_74 = arith.constant 1.000000e-01 : f32
    %238 = vector.broadcast %cst_74 : f32 to vector<8x2xf32>
    %239 = arith.mulf %237, %238 : vector<8x2xf32>
    %240 = arith.addf %196, %239 : vector<8x2xf32>
    %cst_75 = arith.constant 1.000000e-01 : f32
    %241 = vector.broadcast %cst_75 : f32 to vector<8x2xf32>
    %242 = arith.mulf %240, %241 : vector<8x2xf32>
    %243 = arith.addf %199, %242 : vector<8x2xf32>
    %244 = arith.truncf %206 : vector<8x32xf32> to vector<8x32xbf16>
    %cst_76 = arith.constant dense<0.000000e+00> : vector<8x32xf32>
    %245 = tpu.matmul %244, %2, %cst_76 {dimension_numbers = #tpu.dot_dimension_numbers<[1], [0], [0], [1], [0, 0, 1, 1], [], []>} : vector<8x32xbf16>, vector<32x32xbf16>, vector<8x32xf32> -> vector<8x32xf32>
    %246 = arith.addf %10, %245 : vector<8x32xf32>
    %247 = arith.truncf %229 : vector<8x2xf32> to vector<8x2xbf16>
    %cst_77 = arith.constant dense<0.000000e+00> : vector<8x32xf32>
    %248 = tpu.matmul %247, %1, %cst_77 {dimension_numbers = #tpu.dot_dimension_numbers<[1], [0], [0], [1], [0, 0, 1, 1], [], []>} : vector<8x2xbf16>, vector<2x32xbf16>, vector<8x32xf32> -> vector<8x32xf32>
    %249 = arith.addf %246, %248 : vector<8x32xf32>
    %250 = math.tanh %249 : vector<8x32xf32>
    %251 = arith.truncf %250 : vector<8x32xf32> to vector<8x32xbf16>
    %cst_78 = arith.constant dense<0.000000e+00> : vector<8x32xf32>
    %252 = tpu.matmul %251, %3, %cst_78 {dimension_numbers = #tpu.dot_dimension_numbers<[1], [0], [0], [1], [0, 0, 1, 1], [], []>} : vector<8x32xbf16>, vector<32x32xbf16>, vector<8x32xf32> -> vector<8x32xf32>
    %253 = arith.addf %252, %13 : vector<8x32xf32>
    %cst_79 = arith.constant 0.000000e+00 : f32
    %254 = vector.broadcast %cst_79 : f32 to vector<8x32xf32>
    %255 = arith.maximumf %253, %254 : vector<8x32xf32>
    %256 = arith.truncf %255 : vector<8x32xf32> to vector<8x32xbf16>
    %cst_80 = arith.constant dense<0.000000e+00> : vector<8x4xf32>
    %257 = tpu.matmul %256, %4, %cst_80 {dimension_numbers = #tpu.dot_dimension_numbers<[1], [0], [0], [1], [0, 0, 1, 1], [], []>} : vector<8x32xbf16>, vector<32x4xbf16>, vector<8x4xf32> -> vector<8x4xf32>
    %258 = arith.addf %257, %16 : vector<8x4xf32>
    %259 = vector.extract_strided_slice %258 {offsets = [0, 0], sizes = [8, 2], strides = [1, 1]} : vector<8x4xf32> to vector<8x2xf32>
    %260 = math.tanh %259 : vector<8x2xf32>
    %cst_81 = arith.constant 2.000000e+00 : f32
    %261 = vector.broadcast %cst_81 : f32 to vector<8x2xf32>
    %262 = arith.mulf %260, %261 : vector<8x2xf32>
    %263 = vector.extract_strided_slice %258 {offsets = [0, 2], sizes = [8, 2], strides = [1, 1]} : vector<8x4xf32> to vector<8x2xf32>
    %264 = arith.negf %263 : vector<8x2xf32>
    %265 = math.exp %264 : vector<8x2xf32>
    %cst_82 = arith.constant 1.000000e+00 : f32
    %266 = vector.broadcast %cst_82 : f32 to vector<8x2xf32>
    %267 = arith.addf %266, %265 : vector<8x2xf32>
    %268 = arith.divf %266, %267 : vector<8x2xf32>
    %cst_83 = arith.constant 3.000000e+01 : f32
    %269 = vector.broadcast %cst_83 : f32 to vector<8x2xf32>
    %270 = arith.mulf %268, %269 : vector<8x2xf32>
    %cst_84 = arith.constant 1.000000e-01 : f32
    %271 = vector.broadcast %cst_84 : f32 to vector<8x2xf32>
    %272 = arith.mulf %262, %271 : vector<8x2xf32>
    %273 = arith.addf %229, %272 : vector<8x2xf32>
    %274 = math.sqrt %270 : vector<8x2xf32>
    %cst_85 = arith.constant 2.000000e+00 : f32
    %275 = vector.broadcast %cst_85 : f32 to vector<8x2xf32>
    %276 = arith.mulf %275, %274 : vector<8x2xf32>
    %277 = arith.subf %273, %243 : vector<8x2xf32>
    %278 = arith.mulf %270, %277 : vector<8x2xf32>
    %279 = arith.subf %262, %240 : vector<8x2xf32>
    %280 = arith.mulf %276, %279 : vector<8x2xf32>
    %281 = arith.addf %278, %280 : vector<8x2xf32>
    %cst_86 = arith.constant 1.000000e-01 : f32
    %282 = vector.broadcast %cst_86 : f32 to vector<8x2xf32>
    %283 = arith.mulf %281, %282 : vector<8x2xf32>
    %284 = arith.addf %240, %283 : vector<8x2xf32>
    %cst_87 = arith.constant 1.000000e-01 : f32
    %285 = vector.broadcast %cst_87 : f32 to vector<8x2xf32>
    %286 = arith.mulf %284, %285 : vector<8x2xf32>
    %287 = arith.addf %243, %286 : vector<8x2xf32>
    %288 = arith.truncf %250 : vector<8x32xf32> to vector<8x32xbf16>
    %cst_88 = arith.constant dense<0.000000e+00> : vector<8x32xf32>
    %289 = tpu.matmul %288, %2, %cst_88 {dimension_numbers = #tpu.dot_dimension_numbers<[1], [0], [0], [1], [0, 0, 1, 1], [], []>} : vector<8x32xbf16>, vector<32x32xbf16>, vector<8x32xf32> -> vector<8x32xf32>
    %290 = arith.addf %10, %289 : vector<8x32xf32>
    %291 = arith.truncf %273 : vector<8x2xf32> to vector<8x2xbf16>
    %cst_89 = arith.constant dense<0.000000e+00> : vector<8x32xf32>
    %292 = tpu.matmul %291, %1, %cst_89 {dimension_numbers = #tpu.dot_dimension_numbers<[1], [0], [0], [1], [0, 0, 1, 1], [], []>} : vector<8x2xbf16>, vector<2x32xbf16>, vector<8x32xf32> -> vector<8x32xf32>
    %293 = arith.addf %290, %292 : vector<8x32xf32>
    %294 = math.tanh %293 : vector<8x32xf32>
    %295 = arith.truncf %294 : vector<8x32xf32> to vector<8x32xbf16>
    %cst_90 = arith.constant dense<0.000000e+00> : vector<8x32xf32>
    %296 = tpu.matmul %295, %3, %cst_90 {dimension_numbers = #tpu.dot_dimension_numbers<[1], [0], [0], [1], [0, 0, 1, 1], [], []>} : vector<8x32xbf16>, vector<32x32xbf16>, vector<8x32xf32> -> vector<8x32xf32>
    %297 = arith.addf %296, %13 : vector<8x32xf32>
    %cst_91 = arith.constant 0.000000e+00 : f32
    %298 = vector.broadcast %cst_91 : f32 to vector<8x32xf32>
    %299 = arith.maximumf %297, %298 : vector<8x32xf32>
    %300 = arith.truncf %299 : vector<8x32xf32> to vector<8x32xbf16>
    %cst_92 = arith.constant dense<0.000000e+00> : vector<8x4xf32>
    %301 = tpu.matmul %300, %4, %cst_92 {dimension_numbers = #tpu.dot_dimension_numbers<[1], [0], [0], [1], [0, 0, 1, 1], [], []>} : vector<8x32xbf16>, vector<32x4xbf16>, vector<8x4xf32> -> vector<8x4xf32>
    %302 = arith.addf %301, %16 : vector<8x4xf32>
    %303 = vector.extract_strided_slice %302 {offsets = [0, 0], sizes = [8, 2], strides = [1, 1]} : vector<8x4xf32> to vector<8x2xf32>
    %304 = math.tanh %303 : vector<8x2xf32>
    %cst_93 = arith.constant 2.000000e+00 : f32
    %305 = vector.broadcast %cst_93 : f32 to vector<8x2xf32>
    %306 = arith.mulf %304, %305 : vector<8x2xf32>
    %307 = vector.extract_strided_slice %302 {offsets = [0, 2], sizes = [8, 2], strides = [1, 1]} : vector<8x4xf32> to vector<8x2xf32>
    %308 = arith.negf %307 : vector<8x2xf32>
    %309 = math.exp %308 : vector<8x2xf32>
    %cst_94 = arith.constant 1.000000e+00 : f32
    %310 = vector.broadcast %cst_94 : f32 to vector<8x2xf32>
    %311 = arith.addf %310, %309 : vector<8x2xf32>
    %312 = arith.divf %310, %311 : vector<8x2xf32>
    %cst_95 = arith.constant 3.000000e+01 : f32
    %313 = vector.broadcast %cst_95 : f32 to vector<8x2xf32>
    %314 = arith.mulf %312, %313 : vector<8x2xf32>
    %cst_96 = arith.constant 1.000000e-01 : f32
    %315 = vector.broadcast %cst_96 : f32 to vector<8x2xf32>
    %316 = arith.mulf %306, %315 : vector<8x2xf32>
    %317 = arith.addf %273, %316 : vector<8x2xf32>
    %318 = math.sqrt %314 : vector<8x2xf32>
    %cst_97 = arith.constant 2.000000e+00 : f32
    %319 = vector.broadcast %cst_97 : f32 to vector<8x2xf32>
    %320 = arith.mulf %319, %318 : vector<8x2xf32>
    %321 = arith.subf %317, %287 : vector<8x2xf32>
    %322 = arith.mulf %314, %321 : vector<8x2xf32>
    %323 = arith.subf %306, %284 : vector<8x2xf32>
    %324 = arith.mulf %320, %323 : vector<8x2xf32>
    %325 = arith.addf %322, %324 : vector<8x2xf32>
    %cst_98 = arith.constant 1.000000e-01 : f32
    %326 = vector.broadcast %cst_98 : f32 to vector<8x2xf32>
    %327 = arith.mulf %325, %326 : vector<8x2xf32>
    %328 = arith.addf %284, %327 : vector<8x2xf32>
    %cst_99 = arith.constant 1.000000e-01 : f32
    %329 = vector.broadcast %cst_99 : f32 to vector<8x2xf32>
    %330 = arith.mulf %328, %329 : vector<8x2xf32>
    %331 = arith.addf %287, %330 : vector<8x2xf32>
    %332 = arith.truncf %294 : vector<8x32xf32> to vector<8x32xbf16>
    %cst_100 = arith.constant dense<0.000000e+00> : vector<8x32xf32>
    %333 = tpu.matmul %332, %2, %cst_100 {dimension_numbers = #tpu.dot_dimension_numbers<[1], [0], [0], [1], [0, 0, 1, 1], [], []>} : vector<8x32xbf16>, vector<32x32xbf16>, vector<8x32xf32> -> vector<8x32xf32>
    %334 = arith.addf %10, %333 : vector<8x32xf32>
    %335 = arith.truncf %317 : vector<8x2xf32> to vector<8x2xbf16>
    %cst_101 = arith.constant dense<0.000000e+00> : vector<8x32xf32>
    %336 = tpu.matmul %335, %1, %cst_101 {dimension_numbers = #tpu.dot_dimension_numbers<[1], [0], [0], [1], [0, 0, 1, 1], [], []>} : vector<8x2xbf16>, vector<2x32xbf16>, vector<8x32xf32> -> vector<8x32xf32>
    %337 = arith.addf %334, %336 : vector<8x32xf32>
    %338 = math.tanh %337 : vector<8x32xf32>
    %339 = arith.truncf %338 : vector<8x32xf32> to vector<8x32xbf16>
    %cst_102 = arith.constant dense<0.000000e+00> : vector<8x32xf32>
    %340 = tpu.matmul %339, %3, %cst_102 {dimension_numbers = #tpu.dot_dimension_numbers<[1], [0], [0], [1], [0, 0, 1, 1], [], []>} : vector<8x32xbf16>, vector<32x32xbf16>, vector<8x32xf32> -> vector<8x32xf32>
    %341 = arith.addf %340, %13 : vector<8x32xf32>
    %cst_103 = arith.constant 0.000000e+00 : f32
    %342 = vector.broadcast %cst_103 : f32 to vector<8x32xf32>
    %343 = arith.maximumf %341, %342 : vector<8x32xf32>
    %344 = arith.truncf %343 : vector<8x32xf32> to vector<8x32xbf16>
    %cst_104 = arith.constant dense<0.000000e+00> : vector<8x4xf32>
    %345 = tpu.matmul %344, %4, %cst_104 {dimension_numbers = #tpu.dot_dimension_numbers<[1], [0], [0], [1], [0, 0, 1, 1], [], []>} : vector<8x32xbf16>, vector<32x4xbf16>, vector<8x4xf32> -> vector<8x4xf32>
    %346 = arith.addf %345, %16 : vector<8x4xf32>
    %347 = vector.extract_strided_slice %346 {offsets = [0, 0], sizes = [8, 2], strides = [1, 1]} : vector<8x4xf32> to vector<8x2xf32>
    %348 = math.tanh %347 : vector<8x2xf32>
    %cst_105 = arith.constant 2.000000e+00 : f32
    %349 = vector.broadcast %cst_105 : f32 to vector<8x2xf32>
    %350 = arith.mulf %348, %349 : vector<8x2xf32>
    %351 = vector.extract_strided_slice %346 {offsets = [0, 2], sizes = [8, 2], strides = [1, 1]} : vector<8x4xf32> to vector<8x2xf32>
    %352 = arith.negf %351 : vector<8x2xf32>
    %353 = math.exp %352 : vector<8x2xf32>
    %cst_106 = arith.constant 1.000000e+00 : f32
    %354 = vector.broadcast %cst_106 : f32 to vector<8x2xf32>
    %355 = arith.addf %354, %353 : vector<8x2xf32>
    %356 = arith.divf %354, %355 : vector<8x2xf32>
    %cst_107 = arith.constant 3.000000e+01 : f32
    %357 = vector.broadcast %cst_107 : f32 to vector<8x2xf32>
    %358 = arith.mulf %356, %357 : vector<8x2xf32>
    %cst_108 = arith.constant 1.000000e-01 : f32
    %359 = vector.broadcast %cst_108 : f32 to vector<8x2xf32>
    %360 = arith.mulf %350, %359 : vector<8x2xf32>
    %361 = arith.addf %317, %360 : vector<8x2xf32>
    %362 = math.sqrt %358 : vector<8x2xf32>
    %cst_109 = arith.constant 2.000000e+00 : f32
    %363 = vector.broadcast %cst_109 : f32 to vector<8x2xf32>
    %364 = arith.mulf %363, %362 : vector<8x2xf32>
    %365 = arith.subf %361, %331 : vector<8x2xf32>
    %366 = arith.mulf %358, %365 : vector<8x2xf32>
    %367 = arith.subf %350, %328 : vector<8x2xf32>
    %368 = arith.mulf %364, %367 : vector<8x2xf32>
    %369 = arith.addf %366, %368 : vector<8x2xf32>
    %370 = vector.shape_cast %61 : vector<8x2xf32> to vector<1x8x2xf32>
    %371 = vector.shape_cast %105 : vector<8x2xf32> to vector<1x8x2xf32>
    %372 = vector.shape_cast %149 : vector<8x2xf32> to vector<1x8x2xf32>
    %373 = vector.shape_cast %193 : vector<8x2xf32> to vector<1x8x2xf32>
    %374 = vector.shape_cast %237 : vector<8x2xf32> to vector<1x8x2xf32>
    %375 = vector.shape_cast %281 : vector<8x2xf32> to vector<1x8x2xf32>
    %376 = vector.shape_cast %325 : vector<8x2xf32> to vector<1x8x2xf32>
    %377 = vector.shape_cast %369 : vector<8x2xf32> to vector<1x8x2xf32>
    %378 = tpu.concatenate %370, %371, %372, %373, %374, %375, %376, %377 in 0 : vector<1x8x2xf32>, vector<1x8x2xf32>, vector<1x8x2xf32>, vector<1x8x2xf32>, vector<1x8x2xf32>, vector<1x8x2xf32>, vector<1x8x2xf32>, vector<1x8x2xf32> -> vector<8x8x2xf32>
    %c0_110 = arith.constant 0 : index
    %c0_111 = arith.constant 0 : index
    %c0_112 = arith.constant 0 : index
    %379 = vector.load %arg4[%c0_110, %c0_111, %c0_112] : memref<8x8x2xf32, #tpu.memory_space<vmem>>, vector<8x8x2xf32>
    tpu.vector_store %arg4[%c0_110, %c0_111, %c0_112], %378 {strides = array<i32>} : memref<8x8x2xf32, #tpu.memory_space<vmem>>, vector<8x8x2xf32>,
    return
  }
  func.func @transform_0(%arg0: i32) -> (i32, i32) {
    %c0_i32 = arith.constant 0 : i32
    %c0_i32_0 = arith.constant 0 : i32
    return %arg0, %c0_i32 : i32, i32
  }
  func.func @transform_1(%arg0: i32) -> (i32, i32) {
    %c0_i32 = arith.constant 0 : i32
    %c0_i32_0 = arith.constant 0 : i32
    %c0_i32_1 = arith.constant 0 : i32
    return %c0_i32, %c0_i32_0 : i32, i32
  }
  func.func @transform_2(%arg0: i32) -> (i32, i32) {
    %c0_i32 = arith.constant 0 : i32
    %c0_i32_0 = arith.constant 0 : i32
    %c0_i32_1 = arith.constant 0 : i32
    return %c0_i32, %c0_i32_0 : i32, i32
  }
  func.func @transform_3(%arg0: i32) -> (i32, i32, i32) {
    %c0_i32 = arith.constant 0 : i32
    %c0_i32_0 = arith.constant 0 : i32
    %c0_i32_1 = arith.constant 0 : i32
    return %c0_i32, %arg0, %c0_i32_0 : i32, i32, i32
  }
}

</mosaic_0001>

<bundles_post_ra>
// kernel: tpu_custom_call.1
= control target key start
LH: loop header
LB: loop body
LE: loop exit
PB: predicated region body
PF: predicated region fallthrough
CT: control target
= control target key end

     0   :  { %s2764_s12 = smov 0   ;;  %s2766_s13 = smov 0   ;;  %s3327_s0 = inlined_call_operand.vmem [shape: f32[16,2], index: 0, kind: input, shape index: {}]   ;;  %s3328_s1 = inlined_call_operand.vmem [shape: bf16[128,32], index: 1, kind: input, shape index: {}]   ;;  %s3329_s2 = inlined_call_operand.vmem [shape: f32[64,32], index: 2, kind: input, shape index: {}]   ;;  %s3330_s3 = inlined_call_operand.vmem [shape: f32[8,16,2], index: 3, kind: output, shape index: {}]  }
   0x1   :  { %s2768_s14 = smov 0  }
   0x2 LB: > { %s2777_s15 = sadd.s32 4294967295, %s2738_s14   ;;  %s2779_s16 = sadd.s32 1, %s2738_s14   ;;  %s2738_s14 = sphi %s2768_s14, %s3334_s14   ;;  %s2734_s13 = sphi %s2766_s13, %s3333_s13   ;;  %s2730_s12 = sphi %s2764_s12, %s3332_s12  }
   0x3   : > { %s85_s17 = ssub.s32 %s2738_s14, %s2779_s16  ;;  %s88_s18 = sadd.s32 1, %s2734_s13 }
   0x4   : > { %p86_p0 = scmp.eq.s32.totalorder %s85_s17, 0  ;;  %p98_p1 = scmp.ne.s32.totalorder %s2734_s13, %s2730_s12 }
   0x5   : > { %p99_p2 = scmp.eq.s32.totalorder %s2777_s15, 1  ;;  %p2199_p3 = scmp.ge.s32.totalorder %s2738_s14, 1 }
   0x6   : > { %s2787_s19 = scalar_select %p86_p0, %s2734_s13, %s88_s18  }
   0x7   : > { %p2789_p4 = por %p99_p2, %p98_p1  ;;  %p136_p5 = scmp.lt.s32.totalorder %s2738_s14, 3 }
   0x9   : > { %p137_p6 = pnand %p2199_p3, %p136_p5 }
   0xa   : > { %p158_p7 = scmp.lt.s32.totalorder (!%p137_p6), %s2777_s15, 1  ;;  %s2743_s30 = smov (!%p137_p6), 126  }
   0xb   : > { %140 = sbr.rel (%p137_p6) target bundleno = 5483 (0x156b), region = 32  ;;  %s155_s28 = sand.u32 (!%p137_p6), 1, %s2730_s12  }
  0x10   : > { %v163_v0 = vld [vmem:[%s3328_s1] sm:$0x1]  ;;  %vm203_vm0 = vcmask 1040384   ;;  %v2740_v1 = vmov 0.0   ;;  %vm2741_vm1 = vmmov 0   ;;  %s159_s25 = scalar_select %p158_p7, %s2777_s15, 1 }
  0x11   : > { %2347 = vmatprep.subr.bf16.mxu0 %v2740_v1  ;;  %v205_v2 = vsel %vm203_vm0, %v163_v0, 0  ;;  %2353 = vmatprep.subr.bf16.mxu1 %v2740_v1  ;;  %v164_v3 = vld [vmem:[%s3328_s1 + $0x8] sm:$0x1]  ;;  %vm199_vm2 = vcmask 15360   ;;  %v2830_v7 = vld [vmem:[%s3328_s1 + $0x18] sm:$0xff]   ;;  %v2837_v8 = vld [vmem:[%s3328_s1 + $0x10] sm:$0xff]  }
  0x12   : > { %2348 = vmatpush3.bf16.msra.mxu0 %v205_v2  ;;  %2349 = vmatprep.mubr.msk.bf16.mxu0 %vm2741_vm1, %v2740_v1  ;;  %s2201_s26 = sshll.u32 %s159_s25, 3  ;;  %v2815_v5 = vsel %vm203_vm0, %v164_v3, 0  ;;  %v2202_v9 = vld [vmem:[%s3329_s2] ss:$0 sm:$0xff]  ;;  %vm261_vm3 = vcmask 261120   ;;  %v2850_v21 = vld [vmem:[%s3328_s1 + $0x28] sm:$0xff]  }
  0x13   : > { %2361 = vmatprep.subr.bf16.mxu0 %v2740_v1  ;;  %2357 = vmatprep.mubr.msk.bf16.mxu1 %vm2741_vm1, %v2740_v1  ;;  %s161_s29 = scalar_lea.vmem %s3327_s0, %s2201_s26  ;;  %v2857_v22 = vld [vmem:[%s3328_s1 + $0x20] sm:$0xff]   ;;  %v2864_v23 = vld [vmem:[%s3328_s1 + $0x38] sm:$0xff]   ;;  %v2871_v24 = vld [vmem:[%s3329_s2 + $0x10] ss:$0 sm:$0xff]  ;;  %s2254_s12 = sshll.u32 (%p2789_p4), %s2777_s15, 3 }
  0x14   : > { %v2812_v4 = vld [vmem:[%s161_s29] sm:$0xff]  ;;  %2354 = vmatpush3.bf16.msra.mxu1 %v2830_v7  ;;  %v2891_v33 = vld [vmem:[%s3328_s1 + $0x30] sm:$0xff]   ;;  %s2742_s29 = smov 2   ;;  %s2083_s6 = scalar_lea.vmem (%p2789_p4), %s3330_s3, %s2254_s12 }
  0x15   : > { %v198_v6 = vpack.c.bf16 %v2812_v4, %v2812_v4  ;;  %2355 = vmatprep.subr.bf16.mxu1 %v2740_v1  ;;  %v2898_v34 = vld [vmem:[%s3329_s2 + $0x20] ss:$0 sm:$0xff]  ;;  %v2909_v46 = vld [vmem:[%s3329_s2 + $0x30] ss:$0 sm:$0xff] }
  0x17   : > { %2350 = vmatmul.mubr.msk.bf16.vlgmr.msra.gmra.mxu0 %vm199_vm2, %v198_v6 }
  0x18   : > { %2362 = vmatpush3.bf16.msra.mxu0 %v2815_v5  ;;  %2363 = vmatprep.mubr.msk.bf16.mxu0 %vm2741_vm1, %v2740_v1 }
  0x19   : > { %2375 = vmatprep.subr.bf16.mxu0 %v2740_v1  ;;  %2356 = vmatpush3.bf16.msra.mxu1 %v2837_v8 }
  0x1a   : > { %2367 = vmatprep.subr.bf16.mxu1 %v2740_v1 }
  0x1f   : > { %2364 = vmatmul.mubr.msk.bf16.vlgmr.msra.gmra.mxu0 %vm199_vm2, %v198_v6 }
  0x20   : > { %2379 = vmatprep.mubr.msk.bf16.mxu0 %vm2741_vm1, %v2740_v1  ;;  %2376 = vmatpush3.bf16.msra.mxu0 %v2864_v23 }
  0x21   : > { %2377 = vmatprep.subr.bf16.mxu0 %v2740_v1 }
  0x24   : > { %2378 = vmatpush3.bf16.msra.mxu0 %v2891_v33 }
  0x25   : > { %2391 = vmatprep.subr.bf16.mxu0 %v2740_v1 }
  0xd7   : > { %v241_v10 = vpop.f32.mrf.mxu0 }
  0xd8   : > { %v242_v11 = vadd.f32 %v2202_v9, %v241_v10 }
  0xd9   : > { %v2351_v12 = vpop.f32.mrf.mxu0 }
  0xda   : > { %v247_v13 = vmax.f32 %v242_v11, 0.0 }
  0xdb   : > { %v244_v14 = vpop.f32.mrf.mxu0 }
  0xdc   : > { %v248_v15 = vpack.c.bf16 %v247_v13, %v247_v13 }
  0xdd   : > { %v2352_v16 = vpop.f32.mrf.mxu0 }
  0xde   : > { %2358 = vmatmul.mubr.msk.bf16.vlgmr.msra.gmra.mxu1 %vm261_vm3, %v248_v15 }
  0xdf   : > { %v343_v17 = vpop.f32.mrf.mxu0  ;;  %2371 = vmatprep.mubr.msk.bf16.mxu1 %vm2741_vm1, %v2740_v1  ;;  %2368 = vmatpush3.bf16.msra.mxu1 %v2850_v21 }
  0xe0   : > { %2369 = vmatprep.subr.bf16.mxu1 %v2740_v1 }
  0xe1   : > { %v2365_v18 = vpop.f32.mrf.mxu0 }
  0xe3   : > { %v346_v19 = vpop.f32.mrf.mxu0  ;;  %2370 = vmatpush3.bf16.msra.mxu1 %v2857_v22 }
  0xe4   : > { %2383 = vmatprep.subr.bf16.mxu1 %v2740_v1 }
  0xe5   : > { %v2366_v20 = vpop.f32.mrf.mxu0 }
 0x19e   : > { %v299_v25 = vpop.f32.mrf.mxu1 }
 0x19f   : > { %v305_v26 = vadd.f32 %v2871_v24, %v299_v25 }
 0x1a0   : > { %v2359_v27 = vpop.f32.mrf.mxu1 }
 0x1a1   : > { %v349_v28 = vadd.f32 %v343_v17, %v305_v26 }
 0x1a2   : > { %v302_v29 = vpop.f32.mrf.mxu1 }
 0x1a3   : > { %2627 = vtanh.f32 %v349_v28 }
 0x1a4   : > { %v2360_v30 = vpop.f32.mrf.mxu1 }
 0x1b0   : > { %v2628_v31 = vpop.eup %2627 }
 0x1b1   : > { %v351_v32 = vpack.c.bf16 %v2628_v31, %v2628_v31 }
 0x1b3   : > { %2372 = vmatmul.mubr.msk.bf16.vlgmr.msra.gmra.mxu1 %vm261_vm3, %v351_v32 }
 0x1b4   : > { %2384 = vmatpush3.bf16.msra.mxu1 %v2830_v7  ;;  %2387 = vmatprep.mubr.msk.bf16.mxu1 %vm2741_vm1, %v2740_v1 }
 0x1b5   : > { %2385 = vmatprep.subr.bf16.mxu1 %v2740_v1 }
 0x1b8   : > { %2386 = vmatpush3.bf16.msra.mxu1 %v2837_v8 }
 0x1b9   : > { %2397 = vmatprep.subr.bf16.mxu1 %v2740_v1 }
 0x1bb   : > { %2388 = vmatmul.mubr.msk.bf16.vlgmr.msra.gmra.mxu1 %vm261_vm3, %v351_v32 }
 0x1bc   : > { %2398 = vmatpush3.bf16.msra.mxu1 %v2850_v21  ;;  %2401 = vmatprep.mubr.msk.bf16.mxu1 %vm2741_vm1, %v2740_v1 }
 0x1bd   : > { %2399 = vmatprep.subr.bf16.mxu1 %v2740_v1 }
 0x1c0   : > { %2400 = vmatpush3.bf16.msra.mxu1 %v2857_v22 }
 0x1c1   : > { %2413 = vmatprep.subr.bf16.mxu1 %v2740_v1 }
 0x273   : > { %v401_v35 = vpop.f32.mrf.mxu1 }
 0x274   : > { %v402_v36 = vadd.f32 %v2898_v34, %v401_v35 }
 0x275   : > { %v2373_v37 = vpop.f32.mrf.mxu1 }
 0x276   : > { %v407_v38 = vmax.f32 %v402_v36, 0.0 }
 0x277   : > { %v404_v39 = vpop.f32.mrf.mxu1 }
 0x278   : > { %v408_v40 = vpack.c.bf16 %v407_v38, %v407_v38 }
 0x279   : > { %v2374_v41 = vpop.f32.mrf.mxu1 }
 0x27a   : > { %2380 = vmatmul.mubr.msk.bf16.vlgmr.msra.gmra.mxu0 %vm261_vm3, %v408_v40 }
 0x27b   : > { %v537_v42 = vpop.f32.mrf.mxu1  ;;  %2392 = vmatpush3.bf16.msra.mxu0 %v2815_v5  ;;  %2393 = vmatprep.mubr.msk.bf16.mxu0 %vm2741_vm1, %v2740_v1 }
 0x27c   : > { %2405 = vmatprep.subr.bf16.mxu0 %v2740_v1  ;;  %v543_v17 = vadd.f32 %v2871_v24, %v537_v42 }
 0x27d   : > { %v2389_v43 = vpop.f32.mrf.mxu1 }
 0x27f   : > { %v540_v44 = vpop.f32.mrf.mxu1 }
 0x281   : > { %v2390_v45 = vpop.f32.mrf.mxu1 }
 0x33a   : > { %v458_v47 = vpop.f32.mrf.mxu0 }
 0x33b   : > { %v459_v48 = vadd.f32 %v2909_v46, %v458_v47 }
 0x33c   : > { %v2381_v49 = vpop.f32.mrf.mxu0 }
 0x33d   : > { %2629 = vtanh.f32 %v459_v48  ;;  %v2217_v58 = vmul.f32 -1.442695, %v459_v48 }
 0x33e   : > { %v461_v50 = vpop.f32.mrf.mxu0 }
 0x33f   : > { %2631 = vpow2.f32 %v2217_v58 }
 0x340   : > { %v2382_v51 = vpop.f32.mrf.mxu0 }
 0x34a   : > { %v2630_v52 = vpop.eup %2629 }
 0x34b   : > { %v465_v53 = vmul.f32 2.0, %v2630_v52 }
 0x34c   : > { %v2632_v59 = vpop.eup %2631 }
 0x34d   : > { %v473_v54 = vmul.f32 0.1, %v465_v53  ;;  %v469_v60 = vadd.f32 1.0, %v2632_v59 }
 0x34f   : > { %v2913_v55 = vadd.f32 %v473_v54, %v2812_v4  ;;  %2633 = vrcp.f32 %v469_v60 }
 0x351   : > { %v544_v56 = vpack.c.bf16 %v2913_v55, %v2913_v55  ;;  %v483_v57 = vsub.f32 %v2913_v55, %v2812_v4 }
 0x353   : > { %2394 = vmatmul.mubr.msk.bf16.vlgmr.msra.gmra.mxu0 %vm199_vm2, %v544_v56  ;;  %485 = vrot.lane.b32.xlu0 %v483_v57, %s2742_s29 }
 0x354   : > { %2406 = vmatpush3.bf16.msra.mxu0 %v2864_v23  ;;  %2409 = vmatprep.mubr.msk.bf16.mxu0 %vm2741_vm1, %v2740_v1 }
 0x355   : > { %2407 = vmatprep.subr.bf16.mxu0 %v2740_v1 }
 0x357   : > { %490 = vrot.lane.b32.xlu0 %v465_v53, %s2742_s29 }
 0x358   : > { %2408 = vmatpush3.bf16.msra.mxu0 %v2891_v33 }
 0x359   : > { %2421 = vmatprep.subr.bf16.mxu0 %v2740_v1 }
 0x35c   : > { %v2634_v61 = vpop.eup %2633 }
 0x35d   : > { %v472_v62 = vmul.f32 30.0, %v2634_v61 }
 0x35f   : > { %2635 = vrsqrt.f32 %v472_v62  ;;  %vm477_vm4 = vcmp.eq.f32.partialorder %v472_v62, inf  ;;  %v480_v3 = vand.u32 2147483648, %v472_v62  ;;  %vm479_vm5 = vcmp.eq.f32.partialorder %v472_v62, 0.0 }
 0x36c   : > { %v2636_v63 = vpop.eup %2635 }
 0x36d   : > { %v476_v0 = vmul.f32 %v2636_v63, %v472_v62 }
 0x36f   : > { %v478_v2 = vsel %vm477_vm4, %v472_v62, %v476_v0 }
 0x370   : > { %v481_v9 = vsel %vm479_vm5, %v480_v3, %v478_v2 }
 0x371   : > { %v482_v10 = vmul.f32 2.0, %v481_v9 }
 0x3c5   : > { %v486_v6 = vpop.permute.xlu0 %485 }
 0x3c6   : > { %v488_v12 = vmul.f32 %v486_v6, %v472_v62 }
 0x3c9   : > { %v491_v11 = vpop.permute.xlu0 %490 }
 0x3ca   : > { %v493_v13 = vmul.f32 %v491_v11, %v482_v10 }
 0x3cc   : > { %v2928_v14 = vadd.f32 %v493_v13, %v488_v12 }
 0x3ce   : > { %v2931_v15 = vmul.f32 0.1, %v2928_v14 }
 0x3d0   : > { %v497_v16 = vmul.f32 0.1, %v2931_v15 }
 0x3d2   : > { %499 = vrot.lane.b32.xlu1 %v497_v16, %s2743_s30 }
 0x3d6   : > { %705 = vrot.lane.b32.xlu1 %v2931_v15, %s2743_s30 }
 0x413   : > { %v582_v18 = vpop.f32.mrf.mxu0 }
 0x414   : > { %v588_v19 = vadd.f32 %v582_v18, %v543_v17 }
 0x415   : > { %v2395_v20 = vpop.f32.mrf.mxu0 }
 0x416   : > { %2637 = vtanh.f32 %v588_v19 }
 0x417   : > { %v585_v25 = vpop.f32.mrf.mxu0 }
 0x419   : > { %v2396_v26 = vpop.f32.mrf.mxu0 }
 0x423   : > { %v2638_v27 = vpop.eup %2637 }
 0x424   : > { %v590_v28 = vpack.c.bf16 %v2638_v27, %v2638_v27 }
 0x426   : > { %2402 = vmatmul.mubr.msk.bf16.vlgmr.msra.gmra.mxu1 %vm261_vm3, %v590_v28 }
 0x427   : > { %2414 = vmatpush3.bf16.msra.mxu1 %v2830_v7  ;;  %2417 = vmatprep.mubr.msk.bf16.mxu1 %vm2741_vm1, %v2740_v1 }
 0x428   : > { %2415 = vmatprep.subr.bf16.mxu1 %v2740_v1 }
 0x42b   : > { %2416 = vmatpush3.bf16.msra.mxu1 %v2837_v8 }
 0x42c   : > { %2427 = vmatprep.subr.bf16.mxu1 %v2740_v1 }
 0x42e   : > { %2418 = vmatmul.mubr.msk.bf16.vlgmr.msra.gmra.mxu1 %vm261_vm3, %v590_v28 }
 0x42f   : > { %2428 = vmatpush3.bf16.msra.mxu1 %v2850_v21  ;;  %2431 = vmatprep.mubr.msk.bf16.mxu1 %vm2741_vm1, %v2740_v1 }
 0x430   : > { %2429 = vmatprep.subr.bf16.mxu1 %v2740_v1 }
 0x433   : > { %2430 = vmatpush3.bf16.msra.mxu1 %v2857_v22 }
 0x434   : > { %2443 = vmatprep.subr.bf16.mxu1 %v2740_v1 }
 0x444   : > { %v500_v48 = vpop.permute.xlu1 %499 }
 0x445   : > { %v2960_v54 = vadd.f32 %v500_v48, %v2812_v4 }
 0x448   : > { %v706_v51 = vpop.permute.xlu1 %705 }
 0x4e6   : > { %v628_v29 = vpop.f32.mrf.mxu1 }
 0x4e7   : > { %v629_v30 = vadd.f32 %v2898_v34, %v628_v29 }
 0x4e8   : > { %v2403_v31 = vpop.f32.mrf.mxu1 }
 0x4e9   : > { %v634_v32 = vmax.f32 %v629_v30, 0.0 }
 0x4ea   : > { %v631_v35 = vpop.f32.mrf.mxu1 }
 0x4eb   : > { %v635_v36 = vpack.c.bf16 %v634_v32, %v634_v32 }
 0x4ec   : > { %v2404_v37 = vpop.f32.mrf.mxu1 }
 0x4ed   : > { %2410 = vmatmul.mubr.msk.bf16.vlgmr.msra.gmra.mxu0 %vm261_vm3, %v635_v36 }
 0x4ee   : > { %v757_v38 = vpop.f32.mrf.mxu1  ;;  %2422 = vmatpush3.bf16.msra.mxu0 %v2815_v5  ;;  %2423 = vmatprep.mubr.msk.bf16.mxu0 %vm2741_vm1, %v2740_v1 }
 0x4ef   : > { %2435 = vmatprep.subr.bf16.mxu0 %v2740_v1  ;;  %v763_v19 = vadd.f32 %v2871_v24, %v757_v38 }
 0x4f0   : > { %v2419_v39 = vpop.f32.mrf.mxu1 }
 0x4f2   : > { %v760_v40 = vpop.f32.mrf.mxu1 }
 0x4f4   : > { %v2420_v41 = vpop.f32.mrf.mxu1 }
 0x5ad   : > { %v673_v42 = vpop.f32.mrf.mxu0 }
 0x5ae   : > { %v674_v43 = vadd.f32 %v2909_v46, %v673_v42 }
 0x5af   : > { %v2411_v44 = vpop.f32.mrf.mxu0 }
 0x5b0   : > { %2639 = vtanh.f32 %v674_v43  ;;  %v2222_v4 = vmul.f32 -1.442695, %v674_v43 }
 0x5b1   : > { %v676_v45 = vpop.f32.mrf.mxu0 }
 0x5b2   : > { %2641 = vpow2.f32 %v2222_v4 }
 0x5b3   : > { %v2412_v47 = vpop.f32.mrf.mxu0 }
 0x5bd   : > { %v2640_v49 = vpop.eup %2639 }
 0x5be   : > { %v680_v50 = vmul.f32 2.0, %v2640_v49 }
 0x5c0   : > { %v708_v52 = vsub.f32 %v680_v50, %v706_v51  ;;  %v688_v53 = vmul.f32 0.1, %v680_v50 }
 0x5c2   : > { %710 = vrot.lane.b32.xlu1 %v708_v52, %s2742_s29  ;;  %v2964_v56 = vadd.f32 %v688_v53, %v2913_v55  ;;  %v2642_v55 = vpop.eup %2641 }
 0x5c3   : > { %v684_v59 = vadd.f32 1.0, %v2642_v55 }
 0x5c4   : > { %v764_v57 = vpack.c.bf16 %v2964_v56, %v2964_v56  ;;  %v698_v58 = vsub.f32 %v2964_v56, %v2960_v54 }
 0x5c5   : > { %2643 = vrcp.f32 %v684_v59 }
 0x5c6   : > { %2424 = vmatmul.mubr.msk.bf16.vlgmr.msra.gmra.mxu0 %vm199_vm2, %v764_v57  ;;  %700 = vrot.lane.b32.xlu0 %v698_v58, %s2742_s29 }
 0x5c7   : > { %2436 = vmatpush3.bf16.msra.mxu0 %v2864_v23  ;;  %2439 = vmatprep.mubr.msk.bf16.mxu0 %vm2741_vm1, %v2740_v1 }
 0x5c8   : > { %2437 = vmatprep.subr.bf16.mxu0 %v2740_v1 }
 0x5cb   : > { %2438 = vmatpush3.bf16.msra.mxu0 %v2891_v33 }
 0x5cc   : > { %2451 = vmatprep.subr.bf16.mxu0 %v2740_v1 }
 0x5d2   : > { %v2644_v60 = vpop.eup %2643 }
 0x5d3   : > { %v687_v61 = vmul.f32 30.0, %v2644_v60 }
 0x5d5   : > { %2645 = vrsqrt.f32 %v687_v61  ;;  %vm692_vm6 = vcmp.eq.f32.partialorder %v687_v61, inf  ;;  %v695_v2 = vand.u32 2147483648, %v687_v61  ;;  %vm694_vm7 = vcmp.eq.f32.partialorder %v687_v61, 0.0 }
 0x5e2   : > { %v2646_v62 = vpop.eup %2645 }
 0x5e3   : > { %v691_v63 = vmul.f32 %v2646_v62, %v687_v61 }
 0x5e5   : > { %v693_v0 = vsel %vm692_vm6, %v687_v61, %v691_v63 }
 0x5e6   : > { %v696_v3 = vsel %vm694_vm7, %v695_v2, %v693_v0 }
 0x5e7   : > { %v697_v9 = vmul.f32 2.0, %v696_v3 }
 0x634   : > { %v711_v6 = vpop.permute.xlu1 %710 }
 0x635   : > { %v713_v11 = vmul.f32 %v711_v6, %v697_v9 }
 0x638   : > { %v701_v10 = vpop.permute.xlu0 %700 }
 0x639   : > { %v703_v12 = vmul.f32 %v701_v10, %v687_v61 }
 0x63b   : > { %v2978_v13 = vadd.f32 %v713_v11, %v703_v12 }
 0x63d   : > { %v715_v16 = vmul.f32 0.1, %v2978_v13 }
 0x63f   : > { %v2982_v17 = vadd.f32 %v715_v16, %v2931_v15 }
 0x641   : > { %925 = vrot.lane.b32.xlu1 %v2982_v17, %s2743_s30  ;;  %v717_v18 = vmul.f32 0.1, %v2982_v17 }
 0x643   : > { %719 = vrot.lane.b32.xlu0 %v717_v18, %s2743_s30 }
 0x686   : > { %v802_v20 = vpop.f32.mrf.mxu0 }
 0x687   : > { %v808_v25 = vadd.f32 %v802_v20, %v763_v19 }
 0x688   : > { %v2425_v26 = vpop.f32.mrf.mxu0 }
 0x689   : > { %2647 = vtanh.f32 %v808_v25 }
 0x68a   : > { %v805_v27 = vpop.f32.mrf.mxu0 }
 0x68c   : > { %v2426_v28 = vpop.f32.mrf.mxu0 }
 0x696   : > { %v2648_v29 = vpop.eup %2647 }
 0x697   : > { %v810_v30 = vpack.c.bf16 %v2648_v29, %v2648_v29 }
 0x699   : > { %2432 = vmatmul.mubr.msk.bf16.vlgmr.msra.gmra.mxu1 %vm261_vm3, %v810_v30 }
 0x69a   : > { %2444 = vmatpush3.bf16.msra.mxu1 %v2830_v7  ;;  %2447 = vmatprep.mubr.msk.bf16.mxu1 %vm2741_vm1, %v2740_v1 }
 0x69b   : > { %2445 = vmatprep.subr.bf16.mxu1 %v2740_v1 }
 0x69e   : > { %2446 = vmatpush3.bf16.msra.mxu1 %v2837_v8 }
 0x69f   : > { %2457 = vmatprep.subr.bf16.mxu1 %v2740_v1 }
 0x6a1   : > { %2448 = vmatmul.mubr.msk.bf16.vlgmr.msra.gmra.mxu1 %vm261_vm3, %v810_v30 }
 0x6a2   : > { %2458 = vmatpush3.bf16.msra.mxu1 %v2850_v21  ;;  %2461 = vmatprep.mubr.msk.bf16.mxu1 %vm2741_vm1, %v2740_v1 }
 0x6a3   : > { %2459 = vmatprep.subr.bf16.mxu1 %v2740_v1 }
 0x6a6   : > { %2460 = vmatpush3.bf16.msra.mxu1 %v2857_v22 }
 0x6a7   : > { %2473 = vmatprep.subr.bf16.mxu1 %v2740_v1 }
 0x6b3   : > { %v926_v51 = vpop.permute.xlu1 %925 }
 0x6b5   : > { %v720_v52 = vpop.permute.xlu0 %719 }
 0x6b6   : > { %v3011_v58 = vadd.f32 %v720_v52, %v2960_v54 }
 0x759   : > { %v848_v15 = vpop.f32.mrf.mxu1 }
 0x75a   : > { %v849_v31 = vadd.f32 %v2898_v34, %v848_v15 }
 0x75b   : > { %v2433_v32 = vpop.f32.mrf.mxu1 }
 0x75c   : > { %v854_v35 = vmax.f32 %v849_v31, 0.0 }
 0x75d   : > { %v851_v36 = vpop.f32.mrf.mxu1 }
 0x75e   : > { %v855_v37 = vpack.c.bf16 %v854_v35, %v854_v35 }
 0x75f   : > { %v2434_v38 = vpop.f32.mrf.mxu1 }
 0x760   : > { %2440 = vmatmul.mubr.msk.bf16.vlgmr.msra.gmra.mxu0 %vm261_vm3, %v855_v37 }
 0x761   : > { %v977_v39 = vpop.f32.mrf.mxu1  ;;  %2452 = vmatpush3.bf16.msra.mxu0 %v2815_v5  ;;  %2453 = vmatprep.mubr.msk.bf16.mxu0 %vm2741_vm1, %v2740_v1 }
 0x762   : > { %2465 = vmatprep.subr.bf16.mxu0 %v2740_v1  ;;  %v983_v26 = vadd.f32 %v2871_v24, %v977_v39 }
 0x763   : > { %v2449_v40 = vpop.f32.mrf.mxu1 }
 0x765   : > { %v980_v41 = vpop.f32.mrf.mxu1 }
 0x767   : > { %v2450_v42 = vpop.f32.mrf.mxu1 }
 0x820   : > { %v893_v43 = vpop.f32.mrf.mxu0 }
 0x821   : > { %v894_v44 = vadd.f32 %v2909_v46, %v893_v43 }
 0x822   : > { %v2441_v45 = vpop.f32.mrf.mxu0 }
 0x823   : > { %2649 = vtanh.f32 %v894_v44  ;;  %v2227_v54 = vmul.f32 -1.442695, %v894_v44 }
 0x824   : > { %v896_v47 = vpop.f32.mrf.mxu0 }
 0x825   : > { %2651 = vpow2.f32 %v2227_v54 }
 0x826   : > { %v2442_v48 = vpop.f32.mrf.mxu0 }
 0x830   : > { %v2650_v49 = vpop.eup %2649 }
 0x831   : > { %v900_v50 = vmul.f32 2.0, %v2650_v49 }
 0x833   : > { %v928_v53 = vsub.f32 %v900_v50, %v926_v51  ;;  %v908_v57 = vmul.f32 0.1, %v900_v50 }
 0x835   : > { %930 = vrot.lane.b32.xlu1 %v928_v53, %s2742_s29  ;;  %v3015_v4 = vadd.f32 %v908_v57, %v2964_v56  ;;  %v2652_v56 = vpop.eup %2651 }
 0x836   : > { %v904_v60 = vadd.f32 1.0, %v2652_v56 }
 0x837   : > { %v984_v55 = vpack.c.bf16 %v3015_v4, %v3015_v4  ;;  %v918_v59 = vsub.f32 %v3015_v4, %v3011_v58 }
 0x838   : > { %2653 = vrcp.f32 %v904_v60 }
 0x839   : > { %2454 = vmatmul.mubr.msk.bf16.vlgmr.msra.gmra.mxu0 %vm199_vm2, %v984_v55  ;;  %920 = vrot.lane.b32.xlu0 %v918_v59, %s2742_s29 }
 0x83a   : > { %2466 = vmatpush3.bf16.msra.mxu0 %v2864_v23  ;;  %2469 = vmatprep.mubr.msk.bf16.mxu0 %vm2741_vm1, %v2740_v1 }
 0x83b   : > { %2467 = vmatprep.subr.bf16.mxu0 %v2740_v1 }
 0x83e   : > { %2468 = vmatpush3.bf16.msra.mxu0 %v2891_v33 }
 0x83f   : > { %2481 = vmatprep.subr.bf16.mxu0 %v2740_v1 }
 0x845   : > { %v2654_v61 = vpop.eup %2653 }
 0x846   : > { %v907_v62 = vmul.f32 30.0, %v2654_v61 }
 0x848   : > { %2655 = vrsqrt.f32 %v907_v62  ;;  %vm912_vm8 = vcmp.eq.f32.partialorder %v907_v62, inf  ;;  %v915_v3 = vand.u32 2147483648, %v907_v62  ;;  %vm914_vm9 = vcmp.eq.f32.partialorder %v907_v62, 0.0 }
 0x855   : > { %v2656_v63 = vpop.eup %2655 }
 0x856   : > { %v911_v0 = vmul.f32 %v2656_v63, %v907_v62 }
 0x858   : > { %v913_v2 = vsel %vm912_vm8, %v907_v62, %v911_v0 }
 0x859   : > { %v916_v6 = vsel %vm914_vm9, %v915_v3, %v913_v2 }
 0x85a   : > { %v917_v10 = vmul.f32 2.0, %v916_v6 }
 0x8a7   : > { %v931_v9 = vpop.permute.xlu1 %930 }
 0x8a8   : > { %v933_v12 = vmul.f32 %v931_v9, %v917_v10 }
 0x8ab   : > { %v921_v11 = vpop.permute.xlu0 %920 }
 0x8ac   : > { %v923_v16 = vmul.f32 %v921_v11, %v907_v62 }
 0x8ae   : > { %v3029_v18 = vadd.f32 %v933_v12, %v923_v16 }
 0x8b0   : > { %v935_v19 = vmul.f32 0.1, %v3029_v18 }
 0x8b2   : > { %v3033_v20 = vadd.f32 %v935_v19, %v2982_v17 }
 0x8b4   : > { %1145 = vrot.lane.b32.xlu1 %v3033_v20, %s2743_s30  ;;  %v937_v25 = vmul.f32 0.1, %v3033_v20 }
 0x8b6   : > { %939 = vrot.lane.b32.xlu0 %v937_v25, %s2743_s30 }
 0x8f9   : > { %v1022_v27 = vpop.f32.mrf.mxu0 }
 0x8fa   : > { %v1028_v28 = vadd.f32 %v1022_v27, %v983_v26 }
 0x8fb   : > { %v2455_v29 = vpop.f32.mrf.mxu0 }
 0x8fc   : > { %2657 = vtanh.f32 %v1028_v28 }
 0x8fd   : > { %v1025_v30 = vpop.f32.mrf.mxu0 }
 0x8ff   : > { %v2456_v15 = vpop.f32.mrf.mxu0 }
 0x909   : > { %v2658_v31 = vpop.eup %2657 }
 0x90a   : > { %v1030_v32 = vpack.c.bf16 %v2658_v31, %v2658_v31 }
 0x90c   : > { %2462 = vmatmul.mubr.msk.bf16.vlgmr.msra.gmra.mxu1 %vm261_vm3, %v1030_v32 }
 0x90d   : > { %2474 = vmatpush3.bf16.msra.mxu1 %v2830_v7  ;;  %2477 = vmatprep.mubr.msk.bf16.mxu1 %vm2741_vm1, %v2740_v1 }
 0x90e   : > { %2475 = vmatprep.subr.bf16.mxu1 %v2740_v1 }
 0x911   : > { %2476 = vmatpush3.bf16.msra.mxu1 %v2837_v8 }
 0x912   : > { %2487 = vmatprep.subr.bf16.mxu1 %v2740_v1 }
 0x914   : > { %2478 = vmatmul.mubr.msk.bf16.vlgmr.msra.gmra.mxu1 %vm261_vm3, %v1030_v32 }
 0x915   : > { %2488 = vmatpush3.bf16.msra.mxu1 %v2850_v21  ;;  %2491 = vmatprep.mubr.msk.bf16.mxu1 %vm2741_vm1, %v2740_v1 }
 0x916   : > { %2489 = vmatprep.subr.bf16.mxu1 %v2740_v1 }
 0x919   : > { %2490 = vmatpush3.bf16.msra.mxu1 %v2857_v22 }
 0x91a   : > { %2503 = vmatprep.subr.bf16.mxu1 %v2740_v1 }
 0x926   : > { %v1146_v53 = vpop.permute.xlu1 %1145 }
 0x928   : > { %v940_v57 = vpop.permute.xlu0 %939 }
 0x929   : > { %v3062_v54 = vadd.f32 %v940_v57, %v3011_v58 }
 0x9cc   : > { %v1068_v17 = vpop.f32.mrf.mxu1 }
 0x9cd   : > { %v1069_v35 = vadd.f32 %v2898_v34, %v1068_v17 }
 0x9ce   : > { %v2463_v36 = vpop.f32.mrf.mxu1 }
 0x9cf   : > { %v1074_v37 = vmax.f32 %v1069_v35, 0.0 }
 0x9d0   : > { %v1071_v38 = vpop.f32.mrf.mxu1 }
 0x9d1   : > { %v1075_v39 = vpack.c.bf16 %v1074_v37, %v1074_v37 }
 0x9d2   : > { %v2464_v40 = vpop.f32.mrf.mxu1 }
 0x9d3   : > { %2470 = vmatmul.mubr.msk.bf16.vlgmr.msra.gmra.mxu0 %vm261_vm3, %v1075_v39 }
 0x9d4   : > { %v1197_v41 = vpop.f32.mrf.mxu1  ;;  %2482 = vmatpush3.bf16.msra.mxu0 %v2815_v5  ;;  %2483 = vmatprep.mubr.msk.bf16.mxu0 %vm2741_vm1, %v2740_v1 }
 0x9d5   : > { %2495 = vmatprep.subr.bf16.mxu0 %v2740_v1  ;;  %v1203_v30 = vadd.f32 %v2871_v24, %v1197_v41 }
 0x9d6   : > { %v2479_v42 = vpop.f32.mrf.mxu1 }
 0x9d8   : > { %v1200_v43 = vpop.f32.mrf.mxu1 }
 0x9da   : > { %v2480_v44 = vpop.f32.mrf.mxu1 }
 0xa93   : > { %v1113_v45 = vpop.f32.mrf.mxu0 }
 0xa94   : > { %v1114_v47 = vadd.f32 %v2909_v46, %v1113_v45 }
 0xa95   : > { %v2471_v48 = vpop.f32.mrf.mxu0 }
 0xa96   : > { %2659 = vtanh.f32 %v1114_v47  ;;  %v2232_v58 = vmul.f32 -1.442695, %v1114_v47 }
 0xa97   : > { %v1116_v49 = vpop.f32.mrf.mxu0 }
 0xa98   : > { %2661 = vpow2.f32 %v2232_v58 }
 0xa99   : > { %v2472_v50 = vpop.f32.mrf.mxu0 }
 0xaa3   : > { %v2660_v51 = vpop.eup %2659 }
 0xaa4   : > { %v1120_v52 = vmul.f32 2.0, %v2660_v51 }
 0xaa6   : > { %v1148_v55 = vsub.f32 %v1120_v52, %v1146_v53  ;;  %v1128_v59 = vmul.f32 0.1, %v1120_v52 }
 0xaa8   : > { %1150 = vrot.lane.b32.xlu1 %v1148_v55, %s2742_s29  ;;  %v3066_v56 = vadd.f32 %v1128_v59, %v3015_v4  ;;  %v2662_v4 = vpop.eup %2661 }
 0xaa9   : > { %v1124_v62 = vadd.f32 1.0, %v2662_v4 }
 0xaaa   : > { %v1204_v60 = vpack.c.bf16 %v3066_v56, %v3066_v56  ;;  %v1138_v61 = vsub.f32 %v3066_v56, %v3062_v54 }
 0xaab   : > { %2663 = vrcp.f32 %v1124_v62 }
 0xaac   : > { %2484 = vmatmul.mubr.msk.bf16.vlgmr.msra.gmra.mxu0 %vm199_vm2, %v1204_v60  ;;  %1140 = vrot.lane.b32.xlu0 %v1138_v61, %s2742_s29 }
 0xaad   : > { %2496 = vmatpush3.bf16.msra.mxu0 %v2864_v23  ;;  %2499 = vmatprep.mubr.msk.bf16.mxu0 %vm2741_vm1, %v2740_v1 }
 0xaae   : > { %2497 = vmatprep.subr.bf16.mxu0 %v2740_v1 }
 0xab1   : > { %2498 = vmatpush3.bf16.msra.mxu0 %v2891_v33 }
 0xab2   : > { %2511 = vmatprep.subr.bf16.mxu0 %v2740_v1 }
 0xab8   : > { %v2664_v63 = vpop.eup %2663 }
 0xab9   : > { %v1127_v0 = vmul.f32 30.0, %v2664_v63 }
 0xabb   : > { %2665 = vrsqrt.f32 %v1127_v0  ;;  %vm1132_vm10 = vcmp.eq.f32.partialorder %v1127_v0, inf  ;;  %v1135_v9 = vand.u32 2147483648, %v1127_v0  ;;  %vm1134_vm11 = vcmp.eq.f32.partialorder %v1127_v0, 0.0 }
 0xac8   : > { %v2666_v2 = vpop.eup %2665 }
 0xac9   : > { %v1131_v3 = vmul.f32 %v2666_v2, %v1127_v0 }
 0xacb   : > { %v1133_v6 = vsel %vm1132_vm10, %v1127_v0, %v1131_v3 }
 0xacc   : > { %v1136_v10 = vsel %vm1134_vm11, %v1135_v9, %v1133_v6 }
 0xacd   : > { %v1137_v12 = vmul.f32 2.0, %v1136_v10 }
 0xb1a   : > { %v1151_v11 = vpop.permute.xlu1 %1150 }
 0xb1b   : > { %v1153_v19 = vmul.f32 %v1151_v11, %v1137_v12 }
 0xb1e   : > { %v1141_v16 = vpop.permute.xlu0 %1140 }
 0xb1f   : > { %v1143_v25 = vmul.f32 %v1141_v16, %v1127_v0 }
 0xb21   : > { %v3080_v26 = vadd.f32 %v1153_v19, %v1143_v25 }
 0xb23   : > { %v1155_v27 = vmul.f32 0.1, %v3080_v26 }
 0xb25   : > { %v3084_v28 = vadd.f32 %v1155_v27, %v3033_v20 }
 0xb27   : > { %1365 = vrot.lane.b32.xlu1 %v3084_v28, %s2743_s30  ;;  %v1157_v29 = vmul.f32 0.1, %v3084_v28 }
 0xb29   : > { %1159 = vrot.lane.b32.xlu0 %v1157_v29, %s2743_s30 }
 0xb6c   : > { %v1242_v15 = vpop.f32.mrf.mxu0 }
 0xb6d   : > { %v1248_v31 = vadd.f32 %v1242_v15, %v1203_v30 }
 0xb6e   : > { %v2485_v32 = vpop.f32.mrf.mxu0 }
 0xb6f   : > { %2667 = vtanh.f32 %v1248_v31 }
 0xb70   : > { %v1245_v17 = vpop.f32.mrf.mxu0 }
 0xb72   : > { %v2486_v35 = vpop.f32.mrf.mxu0 }
 0xb7c   : > { %v2668_v36 = vpop.eup %2667 }
 0xb7d   : > { %v1250_v37 = vpack.c.bf16 %v2668_v36, %v2668_v36 }
 0xb7f   : > { %2492 = vmatmul.mubr.msk.bf16.vlgmr.msra.gmra.mxu1 %vm261_vm3, %v1250_v37 }
 0xb80   : > { %2504 = vmatpush3.bf16.msra.mxu1 %v2830_v7  ;;  %2507 = vmatprep.mubr.msk.bf16.mxu1 %vm2741_vm1, %v2740_v1 }
 0xb81   : > { %2505 = vmatprep.subr.bf16.mxu1 %v2740_v1 }
 0xb84   : > { %2506 = vmatpush3.bf16.msra.mxu1 %v2837_v8 }
 0xb85   : > { %2517 = vmatprep.subr.bf16.mxu1 %v2740_v1 }
 0xb87   : > { %2508 = vmatmul.mubr.msk.bf16.vlgmr.msra.gmra.mxu1 %vm261_vm3, %v1250_v37 }
 0xb88   : > { %2518 = vmatpush3.bf16.msra.mxu1 %v2850_v21  ;;  %2521 = vmatprep.mubr.msk.bf16.mxu1 %vm2741_vm1, %v2740_v1 }
 0xb89   : > { %2519 = vmatprep.subr.bf16.mxu1 %v2740_v1 }
 0xb8c   : > { %2520 = vmatpush3.bf16.msra.mxu1 %v2857_v22 }
 0xb8d   : > { %2533 = vmatprep.subr.bf16.mxu1 %v2740_v1 }
 0xb99   : > { %v1366_v59 = vpop.permute.xlu1 %1365 }
 0xb9b   : > { %v1160_v60 = vpop.permute.xlu0 %1159 }
 0xb9c   : > { %v3113_v4 = vadd.f32 %v1160_v60, %v3062_v54 }
 0xc3f   : > { %v1288_v20 = vpop.f32.mrf.mxu1 }
 0xc40   : > { %v1289_v38 = vadd.f32 %v2898_v34, %v1288_v20 }
 0xc41   : > { %v2493_v39 = vpop.f32.mrf.mxu1 }
 0xc42   : > { %v1294_v40 = vmax.f32 %v1289_v38, 0.0 }
 0xc43   : > { %v1291_v41 = vpop.f32.mrf.mxu1 }
 0xc44   : > { %v1295_v42 = vpack.c.bf16 %v1294_v40, %v1294_v40 }
 0xc45   : > { %v2494_v43 = vpop.f32.mrf.mxu1 }
 0xc46   : > { %2500 = vmatmul.mubr.msk.bf16.vlgmr.msra.gmra.mxu0 %vm261_vm3, %v1295_v42 }
 0xc47   : > { %v1417_v44 = vpop.f32.mrf.mxu1  ;;  %2512 = vmatpush3.bf16.msra.mxu0 %v2815_v5  ;;  %2513 = vmatprep.mubr.msk.bf16.mxu0 %vm2741_vm1, %v2740_v1 }
 0xc48   : > { %2525 = vmatprep.subr.bf16.mxu0 %v2740_v1  ;;  %v1423_v35 = vadd.f32 %v2871_v24, %v1417_v44 }
 0xc49   : > { %v2509_v45 = vpop.f32.mrf.mxu1 }
 0xc4b   : > { %v1420_v47 = vpop.f32.mrf.mxu1 }
 0xc4d   : > { %v2510_v48 = vpop.f32.mrf.mxu1 }
 0xd06   : > { %v1333_v49 = vpop.f32.mrf.mxu0 }
 0xd07   : > { %v1334_v50 = vadd.f32 %v2909_v46, %v1333_v49 }
 0xd08   : > { %v2501_v51 = vpop.f32.mrf.mxu0 }
 0xd09   : > { %2669 = vtanh.f32 %v1334_v50  ;;  %v2237_v54 = vmul.f32 -1.442695, %v1334_v50 }
 0xd0a   : > { %v1336_v52 = vpop.f32.mrf.mxu0 }
 0xd0b   : > { %2671 = vpow2.f32 %v2237_v54 }
 0xd0c   : > { %v2502_v53 = vpop.f32.mrf.mxu0 }
 0xd16   : > { %v2670_v57 = vpop.eup %2669 }
 0xd17   : > { %v1340_v55 = vmul.f32 2.0, %v2670_v57 }
 0xd19   : > { %v1368_v61 = vsub.f32 %v1340_v55, %v1366_v59  ;;  %v1348_v58 = vmul.f32 0.1, %v1340_v55 }
 0xd1b   : > { %1370 = vrot.lane.b32.xlu1 %v1368_v61, %s2742_s29  ;;  %v3117_v62 = vadd.f32 %v1348_v58, %v3066_v56  ;;  %v2672_v56 = vpop.eup %2671 }
 0xd1c   : > { %v1344_v2 = vadd.f32 1.0, %v2672_v56 }
 0xd1d   : > { %v1424_v63 = vpack.c.bf16 %v3117_v62, %v3117_v62  ;;  %v1358_v0 = vsub.f32 %v3117_v62, %v3113_v4 }
 0xd1e   : > { %2673 = vrcp.f32 %v1344_v2 }
 0xd1f   : > { %2514 = vmatmul.mubr.msk.bf16.vlgmr.msra.gmra.mxu0 %vm199_vm2, %v1424_v63  ;;  %1360 = vrot.lane.b32.xlu0 %v1358_v0, %s2742_s29 }
 0xd20   : > { %2526 = vmatpush3.bf16.msra.mxu0 %v2864_v23  ;;  %2529 = vmatprep.mubr.msk.bf16.mxu0 %vm2741_vm1, %v2740_v1 }
 0xd21   : > { %2527 = vmatprep.subr.bf16.mxu0 %v2740_v1 }
 0xd24   : > { %2528 = vmatpush3.bf16.msra.mxu0 %v2891_v33 }
 0xd25   : > { %2541 = vmatprep.subr.bf16.mxu0 %v2740_v1 }
 0xd2b   : > { %v2674_v3 = vpop.eup %2673 }
 0xd2c   : > { %v1347_v6 = vmul.f32 30.0, %v2674_v3 }
 0xd2e   : > { %2675 = vrsqrt.f32 %v1347_v6  ;;  %vm1352_vm12 = vcmp.eq.f32.partialorder %v1347_v6, inf  ;;  %v1355_v12 = vand.u32 2147483648, %v1347_v6  ;;  %vm1354_vm13 = vcmp.eq.f32.partialorder %v1347_v6, 0.0 }
 0xd3b   : > { %v2676_v9 = vpop.eup %2675 }
 0xd3c   : > { %v1351_v10 = vmul.f32 %v2676_v9, %v1347_v6 }
 0xd3e   : > { %v1353_v11 = vsel %vm1352_vm12, %v1347_v6, %v1351_v10 }
 0xd3f   : > { %v1356_v16 = vsel %vm1354_vm13, %v1355_v12, %v1353_v11 }
 0xd40   : > { %v1357_v25 = vmul.f32 2.0, %v1356_v16 }
 0xd8d   : > { %v1371_v19 = vpop.permute.xlu1 %1370 }
 0xd8e   : > { %v1373_v29 = vmul.f32 %v1371_v19, %v1357_v25 }
 0xd91   : > { %v1361_v27 = vpop.permute.xlu0 %1360 }
 0xd92   : > { %v1363_v30 = vmul.f32 %v1361_v27, %v1347_v6 }
 0xd94   : > { %v3131_v15 = vadd.f32 %v1373_v29, %v1363_v30  ;;  %v3195_v30 = vld [vmem:[%s3329_s2 + $0x10] ss:$0 sm:$0xff] }
 0xd96   : > { %v1375_v31 = vmul.f32 0.1, %v3131_v15 }
 0xd98   : > { %v3135_v32 = vadd.f32 %v1375_v31, %v3084_v28 }
 0xd9a   : > { %1585 = vrot.lane.b32.xlu1 %v3135_v32, %s2743_s30  ;;  %v1377_v17 = vmul.f32 0.1, %v3135_v32 }
 0xd9c   : > { %1379 = vrot.lane.b32.xlu0 %v1377_v17, %s2743_s30 }
 0xddf   : > { %v1462_v36 = vpop.f32.mrf.mxu0 }
 0xde0   : > { %v1468_v37 = vadd.f32 %v1462_v36, %v1423_v35 }
 0xde1   : > { %v2515_v20 = vpop.f32.mrf.mxu0 }
 0xde2   : > { %2677 = vtanh.f32 %v1468_v37 }
 0xde3   : > { %v1465_v38 = vpop.f32.mrf.mxu0 }
 0xde5   : > { %v2516_v39 = vpop.f32.mrf.mxu0 }
 0xde6   : > { %v2708_v39 = vld [vmem:[%s3328_s1 + $0x18] sm:$0xff]  }
 0xdef   : > { %v2678_v40 = vpop.eup %2677 }
 0xdf0   : > { %v1470_v41 = vpack.c.bf16 %v2678_v40, %v2678_v40  ;;  %v2709_v40 = vld [vmem:[%s3328_s1 + $0x10] sm:$0xff]  }
 0xdf2   : > { %2522 = vmatmul.mubr.msk.bf16.vlgmr.msra.gmra.mxu1 %vm261_vm3, %v1470_v41 }
 0xdf3   : > { %2534 = vmatpush3.bf16.msra.mxu1 %v2830_v7  ;;  %2537 = vmatprep.mubr.msk.bf16.mxu1 %vm2741_vm1, %v2740_v1 }
 0xdf4   : > { %2535 = vmatprep.subr.bf16.mxu1 %v2740_v1 }
 0xdf7   : > { %2536 = vmatpush3.bf16.msra.mxu1 %v2837_v8 }
 0xdf8   : > { %2547 = vmatprep.subr.bf16.mxu1 %v2740_v1 }
 0xdfa   : > { %2538 = vmatmul.mubr.msk.bf16.vlgmr.msra.gmra.mxu1 %vm261_vm3, %v1470_v41  ;;  %v2710_v41 = vld [vmem:[%s3328_s1 + $0x28] sm:$0xff]  }
 0xdfb   : > { %2548 = vmatpush3.bf16.msra.mxu1 %v2850_v21  ;;  %2551 = vmatprep.mubr.msk.bf16.mxu1 %vm2741_vm1, %v2740_v1 }
 0xdfc   : > { %2549 = vmatprep.subr.bf16.mxu1 %v2740_v1 }
 0xdff   : > { %2550 = vmatpush3.bf16.msra.mxu1 %v2857_v22 }
 0xe00   : > { %2563 = vmatprep.subr.bf16.mxu1 %v2740_v1 }
 0xe0c   : > { %v1586_v57 = vpop.permute.xlu1 %1585 }
 0xe0e   : > { %v1380_v55 = vpop.permute.xlu0 %1379 }
 0xe0f   : > { %v3164_v61 = vadd.f32 %v1380_v55, %v3113_v4 }
 0xeb2   : > { %v1508_v7 = vpop.f32.mrf.mxu1 }
 0xeb3   : > { %v1509_v24 = vadd.f32 %v2898_v34, %v1508_v7  ;;  %v2711_v7 = vld [vmem:[%s3328_s1 + $0x20] sm:$0xff]  }
 0xeb4   : > { %v2523_v28 = vpop.f32.mrf.mxu1 }
 0xeb5   : > { %v1514_v8 = vmax.f32 %v1509_v24, 0.0  ;;  %v3222_v28 = vld [vmem:[%s3329_s2 + $0x20] ss:$0 sm:$0xff] }
 0xeb6   : > { %v1511_v42 = vpop.f32.mrf.mxu1 }
 0xeb7   : > { %v1515_v43 = vpack.c.bf16 %v1514_v8, %v1514_v8 }
 0xeb8   : > { %v2524_v44 = vpop.f32.mrf.mxu1 }
 0xeb9   : > { %2530 = vmatmul.mubr.msk.bf16.vlgmr.msra.gmra.mxu0 %vm261_vm3, %v1515_v43 }
 0xeba   : > { %v1637_v21 = vpop.f32.mrf.mxu1  ;;  %2542 = vmatpush3.bf16.msra.mxu0 %v2815_v5  ;;  %2543 = vmatprep.mubr.msk.bf16.mxu0 %vm2741_vm1, %v2740_v1 }
 0xebb   : > { %2555 = vmatprep.subr.bf16.mxu0 %v2740_v1  ;;  %v1643_v31 = vadd.f32 %v3195_v30, %v1637_v21 }
 0xebc   : > { %v2539_v22 = vpop.f32.mrf.mxu1 }
 0xebe   : > { %v1640_v45 = vpop.f32.mrf.mxu1 }
 0xec0   : > { %v2540_v47 = vpop.f32.mrf.mxu1 }
 0xf79   : > { %v1553_v48 = vpop.f32.mrf.mxu0 }
 0xf7a   : > { %v1554_v34 = vadd.f32 %v2909_v46, %v1553_v48 }
 0xf7b   : > { %v2531_v49 = vpop.f32.mrf.mxu0 }
 0xf7c   : > { %2679 = vtanh.f32 %v1554_v34  ;;  %v2242_v4 = vmul.f32 -1.442695, %v1554_v34 }
 0xf7d   : > { %v1556_v50 = vpop.f32.mrf.mxu0 }
 0xf7e   : > { %2681 = vpow2.f32 %v2242_v4  ;;  %v3233_v50 = vld [vmem:[%s3329_s2 + $0x30] ss:$0 sm:$0xff] }
 0xf7f   : > { %v2532_v51 = vpop.f32.mrf.mxu0 }
 0xf89   : > { %v2680_v52 = vpop.eup %2679 }
 0xf8a   : > { %v1560_v53 = vmul.f32 2.0, %v2680_v52 }
 0xf8c   : > { %v1588_v59 = vsub.f32 %v1560_v53, %v1586_v57  ;;  %v1568_v60 = vmul.f32 0.1, %v1560_v53 }
 0xf8e   : > { %1590 = vrot.lane.b32.xlu1 %v1588_v59, %s2742_s29  ;;  %v3168_v58 = vadd.f32 %v1568_v60, %v3117_v62  ;;  %v2682_v62 = vpop.eup %2681 }
 0xf8f   : > { %v1564_v0 = vadd.f32 1.0, %v2682_v62 }
 0xf90   : > { %v1644_v46 = vpack.c.bf16 %v3168_v58, %v3168_v58  ;;  %v1578_v63 = vsub.f32 %v3168_v58, %v3164_v61 }
 0xf91   : > { %2683 = vrcp.f32 %v1564_v0 }
 0xf92   : > { %2544 = vmatmul.mubr.msk.bf16.vlgmr.msra.gmra.mxu0 %vm199_vm2, %v1644_v46  ;;  %1580 = vrot.lane.b32.xlu0 %v1578_v63, %s2742_s29 }
 0xf93   : > { %2556 = vmatpush3.bf16.msra.mxu0 %v2864_v23  ;;  %2559 = vmatprep.mubr.msk.bf16.mxu0 %vm2741_vm1, %v2740_v1 }
 0xf94   : > { %2557 = vmatprep.subr.bf16.mxu0 %v2740_v1 }
 0xf97   : > { %2558 = vmatpush3.bf16.msra.mxu0 %v2891_v33 }
 0xf98   : > { %2571 = vmatprep.subr.bf16.mxu0 %v2740_v1 }
 0xf9e   : > { %v2684_v54 = vpop.eup %2683 }
 0xf9f   : > { %v1567_v56 = vmul.f32 30.0, %v2684_v54 }
 0xfa1   : > { %2685 = vrsqrt.f32 %v1567_v56  ;;  %vm1572_vm14 = vcmp.eq.f32.partialorder %v1567_v56, inf  ;;  %v1575_v6 = vand.u32 2147483648, %v1567_v56  ;;  %vm1574_vm15 = vcmp.eq.f32.partialorder %v1567_v56, 0.0 }
 0xfae   : > { %v2686_v2 = vpop.eup %2685 }
 0xfaf   : > { %v1571_v3 = vmul.f32 %v2686_v2, %v1567_v56 }
 0xfb1   : > { %v1573_v23 = vsel %vm1572_vm14, %v1567_v56, %v1571_v3 }
 0xfb2   : > { %v1576_v9 = vsel %vm1574_vm15, %v1575_v6, %v1573_v23 }
 0xfb3   : > { %v1577_v11 = vmul.f32 2.0, %v1576_v9 }
0x1000   : > { %v1591_v10 = vpop.permute.xlu1 %1590 }
0x1001   : > { %v1593_v12 = vmul.f32 %v1591_v10, %v1577_v11 }
0x1004   : > { %v1581_v33 = vpop.permute.xlu0 %1580 }
0x1005   : > { %v1583_v16 = vmul.f32 %v1581_v33, %v1567_v56 }
0x1007   : > { %v3182_v19 = vadd.f32 %v1593_v12, %v1583_v16 }
0x1009   : > { %v1595_v25 = vmul.f32 0.1, %v3182_v19 }
0x100b   : > { %v3186_v27 = vadd.f32 %v1595_v25, %v3135_v32 }
0x100d   : > { %1805 = vrot.lane.b32.xlu1 %v3186_v27, %s2743_s30  ;;  %v1597_v29 = vmul.f32 0.1, %v3186_v27 }
0x100f   : > { %1599 = vrot.lane.b32.xlu0 %v1597_v29, %s2743_s30 }
0x1052   : > { %v1682_v17 = vpop.f32.mrf.mxu0 }
0x1053   : > { %v1688_v35 = vadd.f32 %v1682_v17, %v1643_v31 }
0x1054   : > { %v2545_v36 = vpop.f32.mrf.mxu0 }
0x1055   : > { %2687 = vtanh.f32 %v1688_v35 }
0x1056   : > { %v1685_v32 = vpop.f32.mrf.mxu0 }
0x1058   : > { %v2546_v37 = vpop.f32.mrf.mxu0 }
0x1062   : > { %v2688_v20 = vpop.eup %2687 }
0x1063   : > { %v1690_v38 = vpack.c.bf16 %v2688_v20, %v2688_v20 }
0x1065   : > { %2552 = vmatmul.mubr.msk.bf16.vlgmr.msra.gmra.mxu1 %vm261_vm3, %v1690_v38 }
0x1066   : > { %2564 = vmatpush3.bf16.msra.mxu1 %v2708_v39  ;;  %2567 = vmatprep.mubr.msk.bf16.mxu1 %vm2741_vm1, %v2740_v1 }
0x1067   : > { %2565 = vmatprep.subr.bf16.mxu1 %v2740_v1 }
0x106a   : > { %2566 = vmatpush3.bf16.msra.mxu1 %v2709_v40 }
0x106b   : > { %2577 = vmatprep.subr.bf16.mxu1 %v2740_v1 }
0x106d   : > { %2568 = vmatmul.mubr.msk.bf16.vlgmr.msra.gmra.mxu1 %vm261_vm3, %v1690_v38 }
0x106e   : > { %2578 = vmatpush3.bf16.msra.mxu1 %v2710_v41  ;;  %2581 = vmatprep.mubr.msk.bf16.mxu1 %vm2741_vm1, %v2740_v1 }
0x106f   : > { %2579 = vmatprep.subr.bf16.mxu1 %v2740_v1 }
0x1072   : > { %2580 = vmatpush3.bf16.msra.mxu1 %v2711_v7 }
0x107f   : > { %v1806_v59 = vpop.permute.xlu1 %1805 }
0x1081   : > { %v1600_v60 = vpop.permute.xlu0 %1599 }
0x1082   : > { %v3237_v4 = vadd.f32 %v1600_v60, %v3164_v61  ;;  %v2714_v61 = vld [vmem:[%s3328_s1 + $0x38] sm:$0xff]  }
0x1125   : > { %v1728_v24 = vpop.f32.mrf.mxu1 }
0x1126   : > { %v1729_v8 = vadd.f32 %v3222_v28, %v1728_v24 }
0x1127   : > { %v2553_v42 = vpop.f32.mrf.mxu1 }
0x1128   : > { %v1734_v43 = vmax.f32 %v1729_v8, 0.0 }
0x1129   : > { %v1731_v44 = vpop.f32.mrf.mxu1 }
0x112a   : > { %v1735_v21 = vpack.c.bf16 %v1734_v43, %v1734_v43 }
0x112b   : > { %v2554_v22 = vpop.f32.mrf.mxu1 }
0x112c   : > { %2560 = vmatmul.mubr.msk.bf16.vlgmr.msra.gmra.mxu0 %vm261_vm3, %v1735_v21 }
0x112d   : > { %v1857_v45 = vpop.f32.mrf.mxu1  ;;  %2572 = vmatpush3.bf16.msra.mxu0 %v2815_v5  ;;  %2573 = vmatprep.mubr.msk.bf16.mxu0 %vm2741_vm1, %v2740_v1 }
0x112e   : > { %2585 = vmatprep.subr.bf16.mxu0 %v2740_v1  ;;  %v1863_v37 = vadd.f32 %v3195_v30, %v1857_v45 }
0x112f   : > { %v2569_v47 = vpop.f32.mrf.mxu1 }
0x1131   : > { %v1860_v48 = vpop.f32.mrf.mxu1 }
0x1133   : > { %v2570_v34 = vpop.f32.mrf.mxu1 }
0x11ec   : > { %v1773_v49 = vpop.f32.mrf.mxu0 }
0x11ed   : > { %v1774_v51 = vadd.f32 %v3233_v50, %v1773_v49 }
0x11ee   : > { %v2561_v52 = vpop.f32.mrf.mxu0 }
0x11ef   : > { %2689 = vtanh.f32 %v1774_v51  ;;  %v2247_v56 = vmul.f32 -1.442695, %v1774_v51 }
0x11f0   : > { %v1776_v53 = vpop.f32.mrf.mxu0 }
0x11f1   : > { %2691 = vpow2.f32 %v2247_v56 }
0x11f2   : > { %v2562_v5 = vpop.f32.mrf.mxu0 }
0x11fc   : > { %v2690_v57 = vpop.eup %2689 }
0x11fd   : > { %v1780_v55 = vmul.f32 2.0, %v2690_v57 }
0x11fe   : > { %v2692_v2 = vpop.eup %2691 }
0x11ff   : > { %v1808_v46 = vsub.f32 %v1780_v55, %v1806_v59  ;;  %v1788_v63 = vmul.f32 0.1, %v1780_v55  ;;  %v1784_v3 = vadd.f32 1.0, %v2692_v2 }
0x1201   : > { %1810 = vrot.lane.b32.xlu1 %v1808_v46, %s2742_s29  ;;  %v3241_v62 = vadd.f32 %v1788_v63, %v3168_v58  ;;  %v2715_v58 = vld [vmem:[%s3328_s1 + $0x30] sm:$0xff]   ;;  %2693 = vrcp.f32 %v1784_v3 }
0x1203   : > { %v1864_v0 = vpack.c.bf16 %v3241_v62, %v3241_v62  ;;  %v1798_v54 = vsub.f32 %v3241_v62, %v3237_v4 }
0x1205   : > { %2574 = vmatmul.mubr.msk.bf16.vlgmr.msra.gmra.mxu0 %vm199_vm2, %v1864_v0  ;;  %1800 = vrot.lane.b32.xlu0 %v1798_v54, %s2742_s29 }
0x1206   : > { %2586 = vmatpush3.bf16.msra.mxu0 %v2714_v61  ;;  %2589 = vmatprep.mubr.msk.bf16.mxu0 %vm2741_vm1, %v2740_v1 }
0x1207   : > { %2587 = vmatprep.subr.bf16.mxu0 %v2740_v1 }
0x120a   : > { %2588 = vmatpush3.bf16.msra.mxu0 %v2715_v58 }
0x120e   : > { %v2694_v23 = vpop.eup %2693 }
0x120f   : > { %v1787_v6 = vmul.f32 30.0, %v2694_v23 }
0x1211   : > { %2695 = vrsqrt.f32 %v1787_v6  ;;  %vm1792_vm0 = vcmp.eq.f32.partialorder %v1787_v6, inf  ;;  %v1795_v33 = vand.u32 2147483648, %v1787_v6  ;;  %vm1794_vm1 = vcmp.eq.f32.partialorder %v1787_v6, 0.0 }
0x121e   : > { %v2696_v9 = vpop.eup %2695 }
0x121f   : > { %v1791_v10 = vmul.f32 %v2696_v9, %v1787_v6 }
0x1221   : > { %v1793_v11 = vsel %vm1792_vm0, %v1787_v6, %v1791_v10 }
0x1222   : > { %v1796_v1 = vsel %vm1794_vm1, %v1795_v33, %v1793_v11 }
0x1223   : > { %v1797_v16 = vmul.f32 2.0, %v1796_v1 }
0x1273   : > { %v1811_v12 = vpop.permute.xlu1 %1810 }
0x1274   : > { %v1813_v29 = vmul.f32 %v1811_v12, %v1797_v16 }
0x1277   : > { %v1801_v25 = vpop.permute.xlu0 %1800 }
0x1278   : > { %v1803_v31 = vmul.f32 %v1801_v25, %v1787_v6 }
0x127a   : > { %v1814_v17 = vadd.f32 %v1813_v29, %v1803_v31 }
0x127c   : > { %v1815_v35 = vmul.f32 0.1, %v1814_v17 }
0x127e   : > { %v1816_v36 = vadd.f32 %v1815_v35, %v3186_v27 }
0x1280   : > { %2025 = vrot.lane.b32.xlu1 %v1816_v36, %s2743_s30  ;;  %v1817_v32 = vmul.f32 0.1, %v1816_v36 }
0x1282   : > { %1819 = vrot.lane.b32.xlu0 %v1817_v32, %s2743_s30 }
0x12c5   : > { %v1902_v20 = vpop.f32.mrf.mxu0 }
0x12c6   : > { %v1908_v38 = vadd.f32 %v1902_v20, %v1863_v37 }
0x12c7   : > { %v2575_v39 = vpop.f32.mrf.mxu0 }
0x12c8   : > { %2697 = vtanh.f32 %v1908_v38 }
0x12c9   : > { %v1905_v40 = vpop.f32.mrf.mxu0 }
0x12cb   : > { %v2576_v41 = vpop.f32.mrf.mxu0 }
0x12d5   : > { %v2698_v7 = vpop.eup %2697 }
0x12d6   : > { %v1910_v24 = vpack.c.bf16 %v2698_v7, %v2698_v7 }
0x12d8   : > { %2582 = vmatmul.mubr.msk.bf16.vlgmr.msra.gmra.mxu1 %vm261_vm3, %v1910_v24 }
0x12f2   : > { %v2026_v52 = vpop.permute.xlu1 %2025 }
0x12f4   : > { %v1820_v53 = vpop.permute.xlu0 %1819 }
0x12f5   : > { %v1822_v57 = vadd.f32 %v1820_v53, %v3237_v4 }
0x1398   : > { %v1948_v8 = vpop.f32.mrf.mxu1 }
0x1399   : > { %v1949_v27 = vadd.f32 %v3222_v28, %v1948_v8 }
0x139a   : > { %v2583_v42 = vpop.f32.mrf.mxu1 }
0x139b   : > { %v1954_v43 = vmax.f32 %v1949_v27, 0.0 }
0x139c   : > { %v1951_v44 = vpop.f32.mrf.mxu1 }
0x139d   : > { %v1955_v21 = vpack.c.bf16 %v1954_v43, %v1954_v43 }
0x139e   : > { %v2584_v22 = vpop.f32.mrf.mxu1 }
0x139f   : > { %2590 = vmatmul.mubr.msk.bf16.vlgmr.msra.gmra.mxu0 %vm261_vm3, %v1955_v21 }
0x145f   : > { %v1993_v30 = vpop.f32.mrf.mxu0 }
0x1460   : > { %v1994_v45 = vadd.f32 %v3233_v50, %v1993_v30 }
0x1461   : > { %v2591_v47 = vpop.f32.mrf.mxu0 }
0x1462   : > { %2699 = vtanh.f32 %v1994_v45 }
0x1463   : > { %v1996_v48 = vpop.f32.mrf.mxu0 }
0x1465   : > { %v2592_v34 = vpop.f32.mrf.mxu0 }
0x146f   : > { %v2700_v49 = vpop.eup %2699 }
0x1470   : > { %v2000_v51 = vmul.f32 2.0, %v2700_v49 }
0x1472   : > { %v2028_v5 = vsub.f32 %v2000_v51, %v2026_v52  ;;  %v2008_v28 = vmul.f32 0.1, %v2000_v51 }
0x1474   : > { %2030 = vrot.lane.b32.xlu1 %v2028_v5, %s2742_s29  ;;  %v2009_v55 = vadd.f32 %v2008_v28, %v3241_v62 }
0x1476   : > { %v2018_v59 = vsub.f32 %v2009_v55, %v1822_v57 }
0x1478   : > { %2045 = vrot.lane.b32.xlu1 %v2978_v13, %s2743_s30  ;;  %2020 = vrot.lane.b32.xlu0 %v2018_v59, %s2742_s29  ;;  %v2252_v13 = vmul.f32 -1.442695, %v1994_v45  ;;  %s2200_s29 = sshll.u32 %s155_s28, 6 }
0x1479   : > { %s3284_s4 = scalar_lea.vmem [#allocation2], %s2200_s29 }
0x147a   : > { %2701 = vpow2.f32 %v2252_v13 }
0x147c   : > { %2049 = vrot.lane.b32.xlu1 %v3080_v26, %s2743_s30  ;;  %2043 = vrot.lane.b32.xlu0 %v2928_v14, %s2743_s30 }
0x1480   : > { %2053 = vrot.lane.b32.xlu1 %v3182_v19, %s2743_s30  ;;  %2047 = vrot.lane.b32.xlu0 %v3029_v18, %s2743_s30 }
0x1484   : > { %2051 = vrot.lane.b32.xlu0 %v3131_v15, %s2743_s30 }
0x1487   : > { %v2702_v50 = vpop.eup %2701 }
0x1488   : > { %2055 = vrot.lane.b32.xlu0 %v1814_v17, %s2743_s30  ;;  %v2004_v60 = vadd.f32 1.0, %v2702_v50 }
0x148a   : > { %2703 = vrcp.f32 %v2004_v60 }
0x1497   : > { %v2704_v26 = vpop.eup %2703 }
0x1498   : > { %v2007_v46 = vmul.f32 30.0, %v2704_v26 }
0x149a   : > { %2705 = vrsqrt.f32 %v2007_v46  ;;  %vm2012_vm3 = vcmp.eq.f32.partialorder %v2007_v46, inf  ;;  %v2015_v4 = vand.u32 2147483648, %v2007_v46  ;;  %vm2014_vm4 = vcmp.eq.f32.partialorder %v2007_v46, 0.0 }
0x14a7   : > { %v2706_v14 = vpop.eup %2705 }
0x14a8   : > { %v2011_v63 = vmul.f32 %v2706_v14, %v2007_v46 }
0x14aa   : > { %v2013_v19 = vsel %vm2012_vm3, %v2007_v46, %v2011_v63 }
0x14ab   : > { %v2016_v18 = vsel %vm2014_vm4, %v2015_v4, %v2013_v19 }
0x14ac   : > { %v2017_v62 = vmul.f32 2.0, %v2016_v18 }
0x14e6   : > { %v2031_v15 = vpop.permute.xlu1 %2030 }
0x14e7   : > { %v2033_v61 = vmul.f32 %v2031_v15, %v2017_v62 }
0x14ea   : > { %v2046_v0 = vpop.permute.xlu1 %2045  ;;  %v2021_v54 = vpop.permute.xlu0 %2020 }
0x14eb   : > { %2068 = vst.msk [vmem:[%s3284_s4 + $0x8] sm:$0xff] %vm199_vm2, %v2046_v0  ;;  %v2023_v58 = vmul.f32 %v2021_v54, %v2007_v46 }
0x14ed   : > { %v2034_v56 = vadd.f32 %v2033_v61, %v2023_v58 }
0x14ee   : > { %v2050_v2 = vpop.permute.xlu1 %2049  ;;  %v2044_v3 = vpop.permute.xlu0 %2043 }
0x14ef   : > { %2070 = vst.msk [vmem:[%s3284_s4 + $0x18] sm:$0xff] %vm199_vm2, %v2050_v2  ;;  %2067 = vst.msk [vmem:[%s3284_s4] sm:$0xff] %vm199_vm2, %v2044_v3  ;;  %2057 = vrot.lane.b32.xlu1 %v2034_v56, %s2743_s30 }
0x14f2   : > { %v2054_v23 = vpop.permute.xlu1 %2053  ;;  %v2048_v6 = vpop.permute.xlu0 %2047  ;;  %v2128_v1 = vld [vmem:[%s3284_s4 + $0x8] sm:$0xff] (%p2789_p4) }
0x14f3   : > { %2072 = vst.msk [vmem:[%s3284_s4 + $0x28] sm:$0xff] %vm199_vm2, %v2054_v23  ;;  %2069 = vst.msk [vmem:[%s3284_s4 + $0x10] sm:$0xff] %vm199_vm2, %v2048_v6 }
0x14f4   : > { %2129 = vst [vmem:[%s2083_s6 + $0x10] sm:$0xff] (%p2789_p4), %v2128_v1 }
0x14f6   : > { %v2052_v9 = vpop.permute.xlu0 %2051  ;;  %v2126_v33 = vld [vmem:[%s3284_s4] sm:$0xff] (%p2789_p4)  ;;  %v2132_v16 = vld [vmem:[%s3284_s4 + $0x18] sm:$0xff] (%p2789_p4) }
0x14f7   : > { %2071 = vst.msk [vmem:[%s3284_s4 + $0x20] sm:$0xff] %vm199_vm2, %v2052_v9  ;;  %2127 = vst [vmem:[%s2083_s6] sm:$0xff] (%p2789_p4), %v2126_v33 }
0x14f8   : > { %2133 = vst [vmem:[%s2083_s6 + $0x30] sm:$0xff] (%p2789_p4), %v2132_v16 }
0x14fa   : > { %v2056_v10 = vpop.permute.xlu0 %2055  ;;  %v2130_v12 = vld [vmem:[%s3284_s4 + $0x10] sm:$0xff] (%p2789_p4)  ;;  %v2136_v29 = vld [vmem:[%s3284_s4 + $0x28] sm:$0xff] (%p2789_p4) }
0x14fb   : > { %2073 = vst.msk [vmem:[%s3284_s4 + $0x30] sm:$0xff] %vm199_vm2, %v2056_v10  ;;  %2131 = vst [vmem:[%s2083_s6 + $0x20] sm:$0xff] (%p2789_p4), %v2130_v12 }
0x14fc   : > { %2137 = vst [vmem:[%s2083_s6 + $0x50] sm:$0xff] (%p2789_p4), %v2136_v29 }
0x14fe   : > { %v2134_v25 = vld [vmem:[%s3284_s4 + $0x20] sm:$0xff] (%p2789_p4) }
0x14ff   : > { %2135 = vst [vmem:[%s2083_s6 + $0x40] sm:$0xff] (%p2789_p4), %v2134_v25 }
0x1502   : > { %v2138_v31 = vld [vmem:[%s3284_s4 + $0x30] sm:$0xff] (%p2789_p4) }
0x1503   : > { %2139 = vst [vmem:[%s2083_s6 + $0x60] sm:$0xff] (%p2789_p4), %v2138_v31 }
0x155e   : > { %2081 = sbr.rel (!%p2789_p4) target bundleno = 5483 (0x156b), region = 36 }
0x1561   : > { %v2058_v11 = vpop.permute.xlu1 %2057 }
0x1562   : > { %2074 = vst.msk [vmem:[%s3284_s4 + $0x38] sm:$0xff] %vm199_vm2, %v2058_v11 }
0x1569   : > { %v2140_v17 = vld [vmem:[%s3284_s4 + $0x38] sm:$0xff] }
0x156a   : > { %2141 = vst [vmem:[%s2083_s6 + $0x70] sm:$0xff] %v2140_v17 }
0x156b PF: > { %p10_p8 = scmp.ge.s32.totalorder %s2779_s16, 4   ;;  %s3332_s12 = smov %s2734_s13 }
0x156c   : > { %s3333_s13 = smov %s2787_s19  ;;  %s3334_s14 = smov %s2779_s16 }
0x156d   :  { %12 = sbr.rel (!%p10_p8) target bundleno = 2 (0x2), region = 100 }

</bundles_post_ra>
